<compile_context>
chip_gen: v6e
topology: v6e:2x2x1
jax: 0.10.0
libtpu: 0.0.40
codegen_flags: <defaults>
</compile_context>

<pallas_src>
import functools

import jax
import jax.numpy as jnp
from jax import lax
from jax.experimental import pallas as pl
from jax.experimental.pallas import tpu as pltpu


def _nonlocal_kernel(xq_ref,            # (1, TQ, C)    f32 query tile (resident over k-steps)
                     kv_ref,            # (1, TK, 2IC)  precomputed [phi | g] key tile (cdt)
                     wq_ref, bq_ref,    # (C, IC) cdt, (1, IC) f32   theta projection
                     ww_ref, bw_ref,    # (IC, C) cdt, (1, C)  f32   W conv (BN + b_g folded)
                     out_ref,           # (1, TQ, C)    f32
                     theta_ref,         # scratch (TQ, IC)  cdt
                     m_ref, l_ref,      # scratch (TQ, 1)   f32 running max / sum
                     acc_ref,           # scratch (TQ, IC)  f32 running output
                     *, ic, cdt, hw_real, hw_padded, tk):
    ki = pl.program_id(2)
    nk = pl.num_programs(2)

    # --- per-query-tile init (key-step 0): project theta once, reset softmax state.
    @pl.when(ki == 0)
    def _():
        xq = xq_ref[0].astype(cdt)
        th = jnp.dot(xq, wq_ref[...], preferred_element_type=jnp.float32) + bq_ref[...]
        theta_ref[...] = th.astype(theta_ref.dtype)
        m_ref[...] = jnp.full(m_ref.shape, -jnp.inf, m_ref.dtype)
        l_ref[...] = jnp.zeros(l_ref.shape, l_ref.dtype)
        acc_ref[...] = jnp.zeros(acc_ref.shape, acc_ref.dtype)

    # --- key tile: phi / g come precomputed (no per-step projection matmul).
    kv = kv_ref[0]                       # (TK, 2IC) cdt
    phi = kv[:, :ic]
    g = kv[:, ic:]

    # --- affinity scores: theta @ phi^T via dot_general (contract over IC).
    s = lax.dot_general(theta_ref[...], phi,
                        (((1,), (1,)), ((), ())),
                        preferred_element_type=jnp.float32)    # (TQ, TK) f32

    # --- mask padded keys (only emitted when the token axis was padded).
    if hw_padded != hw_real:
        key_idx = ki * tk + lax.broadcasted_iota(jnp.int32, s.shape, 1)
        s = jnp.where(key_idx < hw_real, s, jnp.float32(-1e30))

    # --- online softmax update (stats in f32).
    m_prev = m_ref[...]
    m_new = jnp.maximum(m_prev, jnp.max(s, axis=-1, keepdims=True))
    alpha = jnp.exp(m_prev - m_new)
    p = jnp.exp(s - m_new)
    l_ref[...] = alpha * l_ref[...] + jnp.sum(p, axis=-1, keepdims=True)
    acc_ref[...] = alpha * acc_ref[...] + jnp.dot(
        p.astype(cdt), g, preferred_element_type=jnp.float32)
    m_ref[...] = m_new

    # --- finalize: normalize once, W conv (BN + b_g folded), residual, store.
    @pl.when(ki == nk - 1)
    def _():
        y = acc_ref[...] * pl.reciprocal(l_ref[...], approx=True)       # (TQ, IC) f32
        wy = jnp.dot(y.astype(cdt), ww_ref[...],
                     preferred_element_type=jnp.float32) + bw_ref[...]   # (TQ, C) f32
        out_ref[0] = (wy + xq_ref[0]).astype(out_ref.dtype)


def _round_up(x, m):
    return ((x + m - 1) // m) * m


def _vmem_capacity_bytes():
    try:
        cap = getattr(pltpu.get_tpu_info(), "vmem_capacity_bytes", None)
        if cap:
            return int(cap)
    except Exception:
        pass
    return 64 * 1024 * 1024   # conservative fallback (v7x-sized)


def _plan_tiling(hw, tq, tk, big_vmem):
    """Pick (tq, tk, padded_hw) such that tq | padded_hw and tk | padded_hw.

    Never degenerates to a single (HW, HW) tile for large HW: the token axis is
    zero-padded instead and padded keys are masked inside the kernel.
    """
    if tq is None:
        tq = 512 if big_vmem else 256      # v5e/v6e (128 MiB VMEM) vs v7x (64 MiB)
    if tk is None:
        tk = 1024 if big_vmem else 512
    tq = max(8, _round_up(int(tq), 8))
    tk = max(8, _round_up(int(tk), 8))
    hw8 = _round_up(hw, 8)
    if hw8 <= tq:                          # everything fits in one tile
        return hw8, hw8, hw8
    if hw8 <= tk:                          # one key tile, several query tiles
        hwp = _round_up(hw, tq)
        return tq, hwp, hwp
    if tk % tq != 0:                       # keep the padding granularity == tk
        tk = _round_up(tk, tq)
    return tq, tk, _round_up(hw, tk)


def _vmem_estimate(tq, tk, c, ic, cdt_bytes):
    f32 = 4
    est = 0
    est += 2 * tq * c * f32                     # x queries (double-buffered)
    est += 2 * tk * 2 * ic * cdt_bytes          # kv stream (double-buffered)
    est += 2 * tq * c * f32                     # out (double-buffered)
    est += 2 * cdt_bytes * (c * ic + ic * c)    # w_q, w_w
    est += 2 * f32 * (ic + c)                   # b_q, b_w
    est += tq * ic * (cdt_bytes + f32) + 2 * tq * f32   # theta / acc / m / l scratch
    est += 3 * tq * tk * f32                    # s, p, exp temporaries
    est += 2 * tk * 2 * ic * f32                # phi/g slice headroom
    return est


def nonlocal_block_forward(x_nchw, params, *, tq=None, tk=None,
                           compute_dtype=jnp.bfloat16):
    """x_nchw: (B, C, H, W) float32. params: dict of weights (see init_params)."""
    B, C, H, W = x_nchw.shape
    HW = H * W
    IC = params["w_theta"].shape[1]
    cdt = jnp.dtype(compute_dtype)

    vmem_cap = _vmem_capacity_bytes()
    big_vmem = vmem_cap >= 100 * 1024 * 1024
    tq, tk, HWp = _plan_tiling(HW, tq, tk, big_vmem)

    # NCHW -> (B, HW, C) tokens (glue, plain JAX); pad token axis if needed.
    x_tok = jnp.transpose(x_nchw, (0, 2, 3, 1)).reshape(B, HW, C).astype(jnp.float32)
    if HWp != HW:
        x_tok = jnp.pad(x_tok, ((0, 0), (0, HWp - HW), (0, 0)))

    # --- weight prep: fold b_phi away, fold b_g + W bias + BatchNorm into W conv.
    w_q = params["w_theta"].astype(cdt)                                   # (C, IC)
    b_q = params["b_theta"].astype(jnp.float32)                           # (1, IC)
    w_kv = jnp.concatenate([params["w_phi"], params["w_g"]], axis=1)      # (C, 2IC)
    w_w = (params["w_W"] * params["bn_scale"]).astype(cdt)                # (IC, C)
    b_w = ((params["b_W"] + params["b_g"] @ params["w_W"]) * params["bn_scale"]
           + params["bn_shift"]).astype(jnp.float32)                      # (1, C)

    # Precompute kv = x @ [w_phi | w_g] once per batch (plain XLA matmul), stream
    # it to the kernel in compute dtype (bf16 by default).
    kv = jnp.einsum("btc,cd->btd", x_tok.astype(cdt), w_kv.astype(cdt),
                    preferred_element_type=jnp.float32).astype(cdt)       # (B, HWp, 2IC)

    est = _vmem_estimate(tq, tk, C, IC, cdt.itemsize)
    vmem_limit = int(min(max(2 * est, 32 * 1024 * 1024), (vmem_cap * 3) // 4))

    const_spec = lambda shape: pl.BlockSpec(shape, lambda b, qi, ki: (0, 0))
    kernel = functools.partial(_nonlocal_kernel, ic=IC, cdt=cdt,
                               hw_real=HW, hw_padded=HWp, tk=tk)

    # NOTE(v7x): B * (HWp // tq) is the megacore-parallel extent; keep it >= 2
    # (shrink tq if B == 1 and HWp == tq) so both TensorCores get work.
    out = pl.pallas_call(
        kernel,
        out_shape=jax.ShapeDtypeStruct((B, HWp, C), jnp.float32),
        grid_spec=pltpu.PrefetchScalarGridSpec(
            num_scalar_prefetch=0,
            grid=(B, HWp // tq, HWp // tk),
            in_specs=[
                pl.BlockSpec((1, tq, C), lambda b, qi, ki: (b, qi, 0)),        # queries / residual
                pl.BlockSpec((1, tk, 2 * IC), lambda b, qi, ki: (b, ki, 0)),   # precomputed phi|g
                const_spec((C, IC)), const_spec((1, IC)),                      # theta projection
                const_spec((IC, C)), const_spec((1, C)),                       # W conv (folded)
            ],
            out_specs=pl.BlockSpec((1, tq, C), lambda b, qi, ki: (b, qi, 0)),
            scratch_shapes=[
                pltpu.VMEM((tq, IC), cdt),           # theta cache
                pltpu.VMEM((tq, 1), jnp.float32),    # running max
                pltpu.VMEM((tq, 1), jnp.float32),    # running sum
                pltpu.VMEM((tq, IC), jnp.float32),   # running output accumulator
            ],
        ),
        compiler_params=pltpu.CompilerParams(
            dimension_semantics=("parallel", "parallel", "arbitrary"),
            vmem_limit_bytes=vmem_limit),
    )(x_tok, kv, w_q, b_q, w_w, b_w)

    out = out[:, :HW, :]
    return jnp.transpose(out.reshape(B, H, W, C), (0, 3, 1, 2))


def init_params(key, in_channels, inter_channels=None):
    if inter_channels is None:
        inter_channels = in_channels // 2
        if inter_channels == 0:
            inter_channels = 1
    C, IC = in_channels, inter_channels
    ks = jax.random.split(key, 4)
    # g / theta / phi: Conv2d weight ~ N(0, 0.01), bias = 0 (as in module init).
    w_g = 0.01 * jax.random.normal(ks[0], (C, IC), jnp.float32)
    w_theta = 0.01 * jax.random.normal(ks[1], (C, IC), jnp.float32)
    w_phi = 0.01 * jax.random.normal(ks[2], (C, IC), jnp.float32)
    w_W = 0.01 * jax.random.normal(ks[3], (IC, C), jnp.float32)
    zeros = lambda n: jnp.zeros((1, n), jnp.float32)
    eps = 1e-5   # BatchNorm2d eval mode at init: mean=0, var=1, gamma=1, beta=0.
    bn_scale = jnp.full((1, C), 1.0 / jnp.sqrt(1.0 + eps), jnp.float32)
    bn_shift = jnp.zeros((1, C), jnp.float32)
    return {
        "w_g": w_g, "b_g": zeros(IC),
        "w_theta": w_theta, "b_theta": zeros(IC),
        "w_phi": w_phi, "b_phi": zeros(IC),
        "w_W": w_W, "b_W": zeros(C),
        "bn_scale": bn_scale, "bn_shift": bn_shift,
    }


def _random_test_params(key, in_channels, inter_channels=None,
                        w_std=0.5, b_std=0.2):
    """Large-magnitude params (nonzero biases / BN) to stress the folding algebra."""
    if inter_channels is None:
        inter_channels = max(in_channels // 2, 1)
    C, IC = in_channels, inter_channels
    ks = jax.random.split(key, 10)
    n = jax.random.normal
    return {
        "w_g": w_std * n(ks[0], (C, IC), jnp.float32),
        "b_g": b_std * n(ks[1], (1, IC), jnp.float32),
        "w_theta": w_std * n(ks[2], (C, IC), jnp.float32),
        "b_theta": b_std * n(ks[3], (1, IC), jnp.float32),
        "w_phi": w_std * n(ks[4], (C, IC), jnp.float32),
        "b_phi": b_std * n(ks[5], (1, IC), jnp.float32),
        "w_W": w_std * n(ks[6], (IC, C), jnp.float32),
        "b_W": b_std * n(ks[7], (1, C), jnp.float32),
        "bn_scale": 1.0 + 0.3 * n(ks[8], (1, C), jnp.float32),
        "bn_shift": b_std * n(ks[9], (1, C), jnp.float32),
    }


def reference_forward(x_nchw, params):
    """Pure-JAX reference (mirrors the PyTorch forward, eval-mode BN)."""
    B, C, H, W = x_nchw.shape
    HW = H * W
    x_tok = jnp.transpose(x_nchw, (0, 2, 3, 1)).reshape(B, HW, C)
    theta = x_tok @ params["w_theta"] + params["b_theta"]
    phi = x_tok @ params["w_phi"] + params["b_phi"]
    g = x_tok @ params["w_g"] + params["b_g"]
    f = jnp.einsum("bqc,bkc->bqk", theta, phi)
    p = jax.nn.softmax(f, axis=-1)
    y = jnp.einsum("bqk,bkc->bqc", p, g)
    wy = y @ params["w_W"] + params["b_W"]
    wy = wy * params["bn_scale"] + params["bn_shift"]
    z = wy + x_tok
    return jnp.transpose(z.reshape(B, H, W, C), (0, 3, 1, 2))


if __name__ == "__main__":
    key = jax.random.PRNGKey(0)
    k_x, k_p, k_x2, k_p2 = jax.random.split(key, 4)

    # --- case 1/2: module-default init, HW divisible by tiles ---
    B, C, H, W = 2, 4, 16, 16
    x = jax.random.normal(k_x, (B, C, H, W), jnp.float32)
    params = init_params(k_p, in_channels=C)
    ref = reference_forward(x, params)

    # f32 operand path; small tiles so the multi-step online-softmax loop runs.
    fwd_f32 = jax.jit(functools.partial(nonlocal_block_forward, params=params,
                                        tq=128, tk=128,
                                        compute_dtype=jnp.float32))
    out_f32 = fwd_f32(x)
    jax.block_until_ready(out_f32)
    assert out_f32.shape == (B, C, H, W)
    err = float(jnp.max(jnp.abs(out_f32 - ref)))
    assert err < 1e-4, f"f32 mismatch vs reference: {err}"

    # default bf16 MXU path with auto tile selection.
    fwd_bf16 = jax.jit(functools.partial(nonlocal_block_forward, params=params))
    out_bf16 = fwd_bf16(x)
    jax.block_until_ready(out_bf16)
    err_bf16 = float(jnp.max(jnp.abs(out_bf16 - ref)))
    assert err_bf16 < 1e-2, f"bf16 mismatch vs reference: {err_bf16}"

    # --- case 3: non-divisible HW (14x14=196) + nonzero biases / BN params.
    # Exercises token-axis padding + in-kernel key masking and the bias folds.
    H2 = W2 = 14
    x2 = jax.random.normal(k_x2, (B, C, H2, W2), jnp.float32)
    params2 = _random_test_params(k_p2, in_channels=C)
    ref2 = reference_forward(x2, params2)
    fwd_pad = jax.jit(functools.partial(nonlocal_block_forward, params=params2,
                                        tq=64, tk=64,
                                        compute_dtype=jnp.float32))
    out_pad = fwd_pad(x2)
    jax.block_until_ready(out_pad)
    assert out_pad.shape == (B, C, H2, W2)
    err_pad = float(jnp.max(jnp.abs(out_pad - ref2)))
    assert err_pad < 1e-2, f"padded-HW mismatch vs reference: {err_pad}"

    print("KERNEL_OK")
</pallas_src>

<mosaic_0001>
module attributes {stable_mosaic.version = 11 : i64} {
  func.func @_nonlocal_kernel(%arg0: i32, %arg1: i32, %arg2: i32, %arg3: memref<1x128x4xf32, #tpu.memory_space<vmem>>, %arg4: memref<1x128x4xf32, #tpu.memory_space<vmem>>, %arg5: memref<4x2xf32, #tpu.memory_space<vmem>>, %arg6: memref<1x2xf32, #tpu.memory_space<vmem>>, %arg7: memref<2x4xf32, #tpu.memory_space<vmem>>, %arg8: memref<1x4xf32, #tpu.memory_space<vmem>>, %arg9: memref<1x128x4xf32, #tpu.memory_space<vmem>>, %arg10: memref<128x2xf32, #tpu.memory_space<vmem>>, %arg11: memref<128x1xf32, #tpu.memory_space<vmem>>, %arg12: memref<128x1xf32, #tpu.memory_space<vmem>>, %arg13: memref<128x2xf32, #tpu.memory_space<vmem>>) attributes {dimension_semantics = [#tpu.dimension_semantics<parallel>, #tpu.dimension_semantics<parallel>, #tpu.dimension_semantics<arbitrary>], iteration_bounds = array<i64: 2, 2, 2>, scalar_prefetch = 0 : i64, scratch_operands = 4 : i64, tpu.core_type = #tpu.core_type<tc>, window_params = [{transform_indices = @transform_0, window_bounds = array<i64: 1, 128, 4>}, {transform_indices = @transform_1, window_bounds = array<i64: 1, 128, 4>}, {pipeline_mode = #tpu.pipeline_mode<synchronous>, transform_indices = @transform_2, window_bounds = array<i64: 4, 2>}, {pipeline_mode = #tpu.pipeline_mode<synchronous>, transform_indices = @transform_3, window_bounds = array<i64: 1, 2>}, {pipeline_mode = #tpu.pipeline_mode<synchronous>, transform_indices = @transform_4, window_bounds = array<i64: 2, 4>}, {pipeline_mode = #tpu.pipeline_mode<synchronous>, transform_indices = @transform_5, window_bounds = array<i64: 1, 4>}, {transform_indices = @transform_6, window_bounds = array<i64: 1, 128, 4>}]} {
    %c0_i32 = arith.constant 0 : i32
    %0 = arith.cmpi eq, %arg2, %c0_i32 : i32
    %1 = arith.extui %0 : i1 to i32
    %c0_i32_0 = arith.constant 0 : i32
    %2 = arith.cmpi ne, %1, %c0_i32_0 : i32
    scf.if %2 {
      %c0_21 = arith.constant 0 : index
      %c0_22 = arith.constant 0 : index
      %c0_23 = arith.constant 0 : index
      %34 = vector.load %arg3[%c0_21, %c0_22, %c0_23] : memref<1x128x4xf32, #tpu.memory_space<vmem>>, vector<1x128x4xf32>
      %35 = vector.shape_cast %34 : vector<1x128x4xf32> to vector<128x4xf32>
      %c0_24 = arith.constant 0 : index
      %c0_25 = arith.constant 0 : index
      %36 = vector.load %arg5[%c0_24, %c0_25] : memref<4x2xf32, #tpu.memory_space<vmem>>, vector<4x2xf32>
      %cst_26 = arith.constant dense<0.000000e+00> : vector<128x2xf32>
      %37 = tpu.matmul %35, %36, %cst_26 {dimension_numbers = #tpu.dot_dimension_numbers<[1], [0], [0], [1], [0, 0, 1, 1], [], []>} : vector<128x4xf32>, vector<4x2xf32>, vector<128x2xf32> -> vector<128x2xf32>
      %c0_27 = arith.constant 0 : index
      %c0_28 = arith.constant 0 : index
      %38 = vector.load %arg6[%c0_27, %c0_28] : memref<1x2xf32, #tpu.memory_space<vmem>>, vector<1x2xf32>
      %39 = vector.broadcast %38 : vector<1x2xf32> to vector<128x2xf32>
      %40 = arith.addf %37, %39 : vector<128x2xf32>
      %c0_29 = arith.constant 0 : index
      %c0_30 = arith.constant 0 : index
      %41 = vector.load %arg10[%c0_29, %c0_30] : memref<128x2xf32, #tpu.memory_space<vmem>>, vector<128x2xf32>
      tpu.vector_store %arg10[%c0_29, %c0_30], %40 {strides = array<i32>} : memref<128x2xf32, #tpu.memory_space<vmem>>, vector<128x2xf32>,
      %cst_31 = arith.constant 0xFF800000 : f32
      %42 = vector.broadcast %cst_31 : f32 to vector<128x1xf32>
      %c0_32 = arith.constant 0 : index
      %c0_33 = arith.constant 0 : index
      %43 = vector.load %arg11[%c0_32, %c0_33] : memref<128x1xf32, #tpu.memory_space<vmem>>, vector<128x1xf32>
      tpu.vector_store %arg11[%c0_32, %c0_33], %42 {strides = array<i32>} : memref<128x1xf32, #tpu.memory_space<vmem>>, vector<128x1xf32>,
      %cst_34 = arith.constant 0.000000e+00 : f32
      %44 = vector.broadcast %cst_34 : f32 to vector<128x1xf32>
      %c0_35 = arith.constant 0 : index
      %c0_36 = arith.constant 0 : index
      %45 = vector.load %arg12[%c0_35, %c0_36] : memref<128x1xf32, #tpu.memory_space<vmem>>, vector<128x1xf32>
      tpu.vector_store %arg12[%c0_35, %c0_36], %44 {strides = array<i32>} : memref<128x1xf32, #tpu.memory_space<vmem>>, vector<128x1xf32>,
      %cst_37 = arith.constant 0.000000e+00 : f32
      %46 = vector.broadcast %cst_37 : f32 to vector<128x2xf32>
      %c0_38 = arith.constant 0 : index
      %c0_39 = arith.constant 0 : index
      %47 = vector.load %arg13[%c0_38, %c0_39] : memref<128x2xf32, #tpu.memory_space<vmem>>, vector<128x2xf32>
      tpu.vector_store %arg13[%c0_38, %c0_39], %46 {strides = array<i32>} : memref<128x2xf32, #tpu.memory_space<vmem>>, vector<128x2xf32>,
    } else {
    }
    %c0 = arith.constant 0 : index
    %c0_1 = arith.constant 0 : index
    %c0_2 = arith.constant 0 : index
    %3 = vector.load %arg4[%c0, %c0_1, %c0_2] : memref<1x128x4xf32, #tpu.memory_space<vmem>>, vector<1x128x4xf32>
    %4 = vector.shape_cast %3 : vector<1x128x4xf32> to vector<128x4xf32>
    %5 = vector.extract_strided_slice %4 {offsets = [0, 0], sizes = [128, 2], strides = [1, 1]} : vector<128x4xf32> to vector<128x2xf32>
    %6 = vector.extract_strided_slice %4 {offsets = [0, 2], sizes = [128, 2], strides = [1, 1]} : vector<128x4xf32> to vector<128x2xf32>
    %c0_3 = arith.constant 0 : index
    %c0_4 = arith.constant 0 : index
    %7 = vector.load %arg10[%c0_3, %c0_4] : memref<128x2xf32, #tpu.memory_space<vmem>>, vector<128x2xf32>
    %cst = arith.constant dense<0.000000e+00> : vector<128x128xf32>
    %8 = tpu.matmul %7, %5, %cst {dimension_numbers = #tpu.dot_dimension_numbers<[1], [1], [0], [0], [0, 0, 1, 0], [], []>} : vector<128x2xf32>, vector<128x2xf32>, vector<128x128xf32> -> vector<128x128xf32>
    %c0_5 = arith.constant 0 : index
    %c0_6 = arith.constant 0 : index
    %9 = vector.load %arg11[%c0_5, %c0_6] : memref<128x1xf32, #tpu.memory_space<vmem>>, vector<128x1xf32>
    %cst_7 = arith.constant dense<0xFF800000> : vector<128xf32>
    %10 = vector.multi_reduction <maximumf>, %8, %cst_7 [1] : vector<128x128xf32> to vector<128xf32>
    %11 = vector.shape_cast %10 : vector<128xf32> to vector<128x1xf32>
    %12 = arith.maximumf %9, %11 : vector<128x1xf32>
    %13 = arith.subf %9, %12 : vector<128x1xf32>
    %14 = math.exp %13 : vector<128x1xf32>
    %15 = vector.broadcast %12 : vector<128x1xf32> to vector<128x128xf32>
    %16 = arith.subf %8, %15 : vector<128x128xf32>
    %17 = math.exp %16 : vector<128x128xf32>
    %c0_8 = arith.constant 0 : index
    %c0_9 = arith.constant 0 : index
    %18 = vector.load %arg12[%c0_8, %c0_9] : memref<128x1xf32, #tpu.memory_space<vmem>>, vector<128x1xf32>
    %19 = arith.mulf %14, %18 : vector<128x1xf32>
    %cst_10 = arith.constant dense<0.000000e+00> : vector<128xf32>
    %20 = vector.multi_reduction <add>, %17, %cst_10 [1] : vector<128x128xf32> to vector<128xf32>
    %21 = vector.shape_cast %20 : vector<128xf32> to vector<128x1xf32>
    %22 = arith.addf %19, %21 : vector<128x1xf32>
    %c0_11 = arith.constant 0 : index
    %c0_12 = arith.constant 0 : index
    %23 = vector.load %arg12[%c0_11, %c0_12] : memref<128x1xf32, #tpu.memory_space<vmem>>, vector<128x1xf32>
    tpu.vector_store %arg12[%c0_11, %c0_12], %22 {strides = array<i32>} : memref<128x1xf32, #tpu.memory_space<vmem>>, vector<128x1xf32>,
    %c0_13 = arith.constant 0 : index
    %c0_14 = arith.constant 0 : index
    %24 = vector.load %arg13[%c0_13, %c0_14] : memref<128x2xf32, #tpu.memory_space<vmem>>, vector<128x2xf32>
    %25 = vector.broadcast %14 : vector<128x1xf32> to vector<128x2xf32>
    %26 = arith.mulf %25, %24 : vector<128x2xf32>
    %cst_15 = arith.constant dense<0.000000e+00> : vector<128x2xf32>
    %27 = tpu.matmul %17, %6, %cst_15 {dimension_numbers = #tpu.dot_dimension_numbers<[1], [0], [0], [1], [0, 0, 1, 1], [], []>} : vector<128x128xf32>, vector<128x2xf32>, vector<128x2xf32> -> vector<128x2xf32>
    %28 = arith.addf %26, %27 : vector<128x2xf32>
    %c0_16 = arith.constant 0 : index
    %c0_17 = arith.constant 0 : index
    %29 = vector.load %arg13[%c0_16, %c0_17] : memref<128x2xf32, #tpu.memory_space<vmem>>, vector<128x2xf32>
    tpu.vector_store %arg13[%c0_16, %c0_17], %28 {strides = array<i32>} : memref<128x2xf32, #tpu.memory_space<vmem>>, vector<128x2xf32>,
    %c0_18 = arith.constant 0 : index
    %c0_19 = arith.constant 0 : index
    %30 = vector.load %arg11[%c0_18, %c0_19] : memref<128x1xf32, #tpu.memory_space<vmem>>, vector<128x1xf32>
    tpu.vector_store %arg11[%c0_18, %c0_19], %12 {strides = array<i32>} : memref<128x1xf32, #tpu.memory_space<vmem>>, vector<128x1xf32>,
    %c1_i32 = arith.constant 1 : i32
    %31 = arith.cmpi eq, %arg2, %c1_i32 : i32
    %32 = arith.extui %31 : i1 to i32
    %c0_i32_20 = arith.constant 0 : i32
    %33 = arith.cmpi ne, %32, %c0_i32_20 : i32
    scf.if %33 {
      %c0_21 = arith.constant 0 : index
      %c0_22 = arith.constant 0 : index
      %34 = vector.load %arg13[%c0_21, %c0_22] : memref<128x2xf32, #tpu.memory_space<vmem>>, vector<128x2xf32>
      %c0_23 = arith.constant 0 : index
      %c0_24 = arith.constant 0 : index
      %35 = vector.load %arg12[%c0_23, %c0_24] : memref<128x1xf32, #tpu.memory_space<vmem>>, vector<128x1xf32>
      %36 = tpu.reciprocal %35 {approx = true} : vector<128x1xf32> -> vector<128x1xf32>
      %37 = vector.broadcast %36 : vector<128x1xf32> to vector<128x2xf32>
      %38 = arith.mulf %34, %37 : vector<128x2xf32>
      %c0_25 = arith.constant 0 : index
      %c0_26 = arith.constant 0 : index
      %39 = vector.load %arg7[%c0_25, %c0_26] : memref<2x4xf32, #tpu.memory_space<vmem>>, vector<2x4xf32>
      %cst_27 = arith.constant dense<0.000000e+00> : vector<128x4xf32>
      %40 = tpu.matmul %38, %39, %cst_27 {dimension_numbers = #tpu.dot_dimension_numbers<[1], [0], [0], [1], [0, 0, 1, 1], [], []>} : vector<128x2xf32>, vector<2x4xf32>, vector<128x4xf32> -> vector<128x4xf32>
      %c0_28 = arith.constant 0 : index
      %c0_29 = arith.constant 0 : index
      %41 = vector.load %arg8[%c0_28, %c0_29] : memref<1x4xf32, #tpu.memory_space<vmem>>, vector<1x4xf32>
      %42 = vector.broadcast %41 : vector<1x4xf32> to vector<128x4xf32>
      %43 = arith.addf %40, %42 : vector<128x4xf32>
      %c0_30 = arith.constant 0 : index
      %c0_31 = arith.constant 0 : index
      %c0_32 = arith.constant 0 : index
      %44 = vector.load %arg3[%c0_30, %c0_31, %c0_32] : memref<1x128x4xf32, #tpu.memory_space<vmem>>, vector<1x128x4xf32>
      %45 = vector.shape_cast %44 : vector<1x128x4xf32> to vector<128x4xf32>
      %46 = arith.addf %43, %45 : vector<128x4xf32>
      %c0_33 = arith.constant 0 : index
      %c0_34 = arith.constant 0 : index
      %c0_35 = arith.constant 0 : index
      %47 = vector.load %arg9[%c0_33, %c0_34, %c0_35] : memref<1x128x4xf32, #tpu.memory_space<vmem>>, vector<1x128x4xf32>
      %48 = vector.shape_cast %47 : vector<1x128x4xf32> to vector<128x4xf32>
      %49 = vector.shape_cast %46 : vector<128x4xf32> to vector<1x128x4xf32>
      tpu.vector_store %arg9[%c0_33, %c0_34, %c0_35], %49 {strides = array<i32>} : memref<1x128x4xf32, #tpu.memory_space<vmem>>, vector<1x128x4xf32>,
    } else {
    }
    return
  }
  func.func @transform_0(%arg0: i32, %arg1: i32, %arg2: i32) -> (i32, i32, i32) {
    %c0_i32 = arith.constant 0 : i32
    %c0_i32_0 = arith.constant 0 : i32
    return %arg0, %arg1, %c0_i32 : i32, i32, i32
  }
  func.func @transform_1(%arg0: i32, %arg1: i32, %arg2: i32) -> (i32, i32, i32) {
    %c0_i32 = arith.constant 0 : i32
    %c0_i32_0 = arith.constant 0 : i32
    return %arg0, %arg2, %c0_i32 : i32, i32, i32
  }
  func.func @transform_2(%arg0: i32, %arg1: i32, %arg2: i32) -> (i32, i32) {
    %c0_i32 = arith.constant 0 : i32
    %c0_i32_0 = arith.constant 0 : i32
    %c0_i32_1 = arith.constant 0 : i32
    return %c0_i32, %c0_i32_0 : i32, i32
  }
  func.func @transform_3(%arg0: i32, %arg1: i32, %arg2: i32) -> (i32, i32) {
    %c0_i32 = arith.constant 0 : i32
    %c0_i32_0 = arith.constant 0 : i32
    %c0_i32_1 = arith.constant 0 : i32
    return %c0_i32, %c0_i32_0 : i32, i32
  }
  func.func @transform_4(%arg0: i32, %arg1: i32, %arg2: i32) -> (i32, i32) {
    %c0_i32 = arith.constant 0 : i32
    %c0_i32_0 = arith.constant 0 : i32
    %c0_i32_1 = arith.constant 0 : i32
    return %c0_i32, %c0_i32_0 : i32, i32
  }
  func.func @transform_5(%arg0: i32, %arg1: i32, %arg2: i32) -> (i32, i32) {
    %c0_i32 = arith.constant 0 : i32
    %c0_i32_0 = arith.constant 0 : i32
    %c0_i32_1 = arith.constant 0 : i32
    return %c0_i32, %c0_i32_0 : i32, i32
  }
  func.func @transform_6(%arg0: i32, %arg1: i32, %arg2: i32) -> (i32, i32, i32) {
    %c0_i32 = arith.constant 0 : i32
    %c0_i32_0 = arith.constant 0 : i32
    return %arg0, %arg1, %c0_i32 : i32, i32, i32
  }
}

</mosaic_0001>

<bundles_post_ra>
// kernel: nonlocal_block_forward.1
= control target key start
LH: loop header
LB: loop body
LE: loop exit
PB: predicated region body
PF: predicated region fallthrough
CT: control target
= control target key end

     0   :  { %s2715_s21 = smov 0   ;;  %s2717_s22 = smov 0   ;;  %s3402_s0 = inlined_call_operand.vmem [shape: f32[2,256,4], index: 0, kind: input, shape index: {}]   ;;  %s3403_s1 = inlined_call_operand.vmem [shape: f32[2,256,4], index: 1, kind: input, shape index: {}]   ;;  %s3404_s2 = inlined_call_operand.vmem [shape: f32[4,2], index: 2, kind: input, shape index: {}]   ;;  %s3405_s3 = inlined_call_operand.vmem [shape: f32[1,2], index: 3, kind: input, shape index: {}]   ;;  %s3406_s4 = inlined_call_operand.vmem [shape: f32[2,4], index: 4, kind: input, shape index: {}]   ;;  %s3407_s5 = inlined_call_operand.vmem [shape: f32[1,4], index: 5, kind: input, shape index: {}]   ;;  %s3408_s6 = inlined_call_operand.vmem [shape: f32[2,256,4], index: 6, kind: output, shape index: {}]  }
   0x1   :  { %s2719_s23 = smov 0   ;;  %s2721_s24 = smov 0  }
   0x2   :  { %s2723_s25 = smov 0   ;;  %s2725_s26 = smov 0  }
   0x3   :  { %s2727_s27 = smov 0  }
   0x4 LB: > { %s28_s28 = sadd.s32 1, %s2661_s24  ;;  %s31_s29 = sadd.s32 1, %s2665_s25  ;;  %s2673_s27 = sphi %s2727_s27, %s16_s27   ;;  %s2669_s26 = sphi %s2725_s26, %s3414_s26   ;;  %s2665_s25 = sphi %s2723_s25, %s3413_s25   ;;  %s2661_s24 = sphi %s2721_s24, %s3412_s24   ;;  %s2657_s23 = sphi %s2719_s23, %s3411_s23   ;;  %s2653_s22 = sphi %s2717_s22, %s3410_s22   ;;  %s2649_s21 = sphi %s2715_s21, %s3409_s21  }
   0x5   : > { %p29_p0 = scmp.ge.s32.totalorder %s28_s28, 2  ;;  %p2110_p1 = scmp.ge.s32.totalorder %s2673_s27, 1 }
   0x6   : > { %p257_p2 = scmp.lt.s32.totalorder %s2673_s27, 9  ;;  %s35_s30 = sadd.s32 1, %s2669_s26 }
   0x7   : > { %s3416_s28 = smov (%p29_p0, %s28_s28), 0  ;;  %s3418_s29 = smov (!%p29_p0, %s31_s29), %s2665_s25 }
   0x8   : > { %p258_p3 = pnand %p2110_p1, %p257_p2  ;;  %p33_p4 = scmp.ge.s32.totalorder %s3418_s29, 2 }
   0x9   : > { %s2111_s7 = sshll.u32 (!%p258_p3), %s2653_s22, 4  ;;  %p305_p6 = scmp.lt.s32.totalorder (!%p258_p3), %s2657_s23, 1 }
   0xa   : > { %s3420_s29 = smov (%p33_p4, %s3418_s29), 0  ;;  %s3422_s30 = smov (!%p33_p4, %s35_s30), %s2669_s26 }
   0xb   : > { %p37_p5 = scmp.ge.s32.totalorder %s3422_s30, 2  ;;  %261 = sbr.rel (%p258_p3) target bundleno = 1438 (0x59e), region = 44 }
   0xc   : > { %p307_p7 = scmp.lt.s32.totalorder (!%p258_p3), %s2111_s7, 31  ;;  %s2114_s8 = sshll.u32 (!%p258_p3), %s2649_s21, 4 }
   0xd   : > { %s3424_s30 = smov (%p37_p5, %s3422_s30), 0  ;;  %p317_p8 = scmp.lt.s32.totalorder (!%p258_p3), %s2114_s8, 31 }
   0xe   : > { %p2120_p9 = scmp.ne.s32.totalorder (!%p258_p3), %s2649_s21, 0 }
  0x10   : > { %s3426_s23 = smov (!%p305_p6, %s2657_s23), 1  ;;  %s3428_s7 = smov (!%p307_p7, %s2111_s7), 31 }
  0x11   : > { %s2112_s9 = sshll.u32 %s3426_s23, 5  ;;  %s3430_s8 = smov (!%p317_p8, %s2114_s8), 31 }
  0x12   : > { %s310_s10 = sadd.s32 %s2112_s9, %s3428_s7  ;;  %s320_s18 = sadd.s32 %s2112_s9, %s3430_s8 }
  0x13   : > { %s2113_s11 = sshll.u32 %s310_s10, 3  ;;  %s2116_s19 = sshll.u32 %s320_s18, 3 }
  0x14   : > { %s2763_s14 = scalar_lea.vmem %s3402_s0, %s2113_s11  ;;  %s2768_s17 = scalar_lea.vmem %s3408_s6, %s2113_s11 }
  0x15   : > { %s2773_s23 = scalar_lea.vmem %s3403_s1, %s2116_s19  ;;  %337 = sbr.rel (%p2120_p9) target bundleno = 240 (0xf0), region = 48 }
  0x1a   : > { %v354_v0 = vld [vmem:[%s3404_s2] sm:$0xf]  ;;  %vm411_vm0 = vcmask 1043456   ;;  %vm362_vm1 = vcmask 31744   ;;  %v339_v3 = vld [vmem:[%s2763_s14 + $0x8] sm:$0xff]  ;;  %v340_v5 = vld [vmem:[%s2763_s14 + $0x10] sm:$0xff] }
  0x1b   : > { %v338_v1 = vld [vmem:[%s2763_s14] sm:$0xff]  ;;  %2290 = vmatprep.subr.msk.mxu0 %vm411_vm0, %v354_v0  ;;  %2454 = vmatprep.subr.msk.mxu1 %vm411_vm0, %v354_v0  ;;  %v347_v4 = vld [vmem:[%s2763_s14 + $0x48] sm:$0xff]  ;;  %v348_v6 = vld [vmem:[%s2763_s14 + $0x50] sm:$0xff]  ;;  %vm560_vm2 = vcmask 15360   ;;  %vm577_vm3 = vcmask 7168   ;;  %v2675_v17 = vmov -inf  }
  0x1c   : > { %v346_v2 = vld [vmem:[%s2763_s14 + $0x40] sm:$0xff]  ;;  %2291 = vmatpush3.msk.msra.mxu0 %vm411_vm0, %v354_v0  ;;  %2455 = vmatpush3.msk.msra.mxu1 %vm411_vm0, %v354_v0  ;;  %v341_v7 = vld [vmem:[%s2763_s14 + $0x18] sm:$0xff]  ;;  %v343_v11 = vld [vmem:[%s2763_s14 + $0x28] sm:$0xff]  ;;  %578 = vst.msk [vmem:[#allocation3] sm:$0xff] %vm577_vm3, %v2675_v17  ;;  %v2676_v18 = vmov 0.0  }
  0x1d   : > { %2292 = vmatprep.mubr.msk.f32.mxu0 %vm362_vm1, %v338_v1  ;;  %2304 = vmatprep.mubr.msk.f32.mxu1 %vm362_vm1, %v346_v2  ;;  %v349_v8 = vld [vmem:[%s2763_s14 + $0x58] sm:$0xff]  ;;  %v342_v9 = vld [vmem:[%s2763_s14 + $0x20] sm:$0xff]  ;;  %v351_v12 = vld [vmem:[%s2763_s14 + $0x68] sm:$0xff]  ;;  %579 = vst.msk [vmem:[#allocation3 + $0x8] sm:$0xff] %vm577_vm3, %v2675_v17 }
  0x1e   : > { %2293 = vmatmul.mubr.msk.f32.vlgmr.msra.gmra.mxu0 %vm362_vm1, %v339_v3  ;;  %2305 = vmatmul.mubr.msk.f32.vlgmr.msra.gmra.mxu1 %vm362_vm1, %v347_v4  ;;  %v350_v10 = vld [vmem:[%s2763_s14 + $0x60] sm:$0xff]  ;;  %v344_v13 = vld [vmem:[%s2763_s14 + $0x30] sm:$0xff]  ;;  %v345_v15 = vld [vmem:[%s2763_s14 + $0x38] sm:$0xff]  ;;  %580 = vst.msk [vmem:[#allocation3 + $0x10] sm:$0xff] %vm577_vm3, %v2675_v17 }
  0x1f   : > { %2295 = vmatprep.mubr.msk.f32.mxu0 %vm362_vm1, %v340_v5  ;;  %2307 = vmatprep.mubr.msk.f32.mxu1 %vm362_vm1, %v348_v6  ;;  %v352_v14 = vld [vmem:[%s2763_s14 + $0x70] sm:$0xff]  ;;  %v353_v16 = vld [vmem:[%s2763_s14 + $0x78] sm:$0xff]  ;;  %581 = vst.msk [vmem:[#allocation3 + $0x18] sm:$0xff] %vm577_vm3, %v2675_v17  ;;  %582 = vst.msk [vmem:[#allocation3 + $0x20] sm:$0xff] %vm577_vm3, %v2675_v17 }
  0x20   : > { %583 = vst.msk [vmem:[#allocation3 + $0x28] sm:$0xff] %vm577_vm3, %v2675_v17  ;;  %584 = vst.msk [vmem:[#allocation3 + $0x30] sm:$0xff] %vm577_vm3, %v2675_v17  ;;  %v2121_v19 = vld [vmem:[%s3405_s3] ss:$0 sm:$0xff] }
  0x21   : > { %585 = vst.msk [vmem:[#allocation3 + $0x38] sm:$0xff] %vm577_vm3, %v2675_v17  ;;  %586 = vst.msk [vmem:[#allocation3 + $0x40] sm:$0xff] %vm577_vm3, %v2675_v17 }
  0x22   : > { %2296 = vmatmul.mubr.msk.f32.gmra.mxu0 %vm362_vm1, %v341_v7  ;;  %2308 = vmatmul.mubr.msk.f32.gmra.mxu1 %vm362_vm1, %v349_v8  ;;  %587 = vst.msk [vmem:[#allocation3 + $0x48] sm:$0xff] %vm577_vm3, %v2675_v17  ;;  %588 = vst.msk [vmem:[#allocation3 + $0x50] sm:$0xff] %vm577_vm3, %v2675_v17 }
  0x23   : > { %2298 = vmatprep.mubr.msk.f32.mxu0 %vm362_vm1, %v342_v9  ;;  %2310 = vmatprep.mubr.msk.f32.mxu1 %vm362_vm1, %v350_v10  ;;  %589 = vst.msk [vmem:[#allocation3 + $0x58] sm:$0xff] %vm577_vm3, %v2675_v17  ;;  %590 = vst.msk [vmem:[#allocation3 + $0x60] sm:$0xff] %vm577_vm3, %v2675_v17 }
  0x24   : > { %591 = vst.msk [vmem:[#allocation3 + $0x68] sm:$0xff] %vm577_vm3, %v2675_v17  ;;  %592 = vst.msk [vmem:[#allocation3 + $0x70] sm:$0xff] %vm577_vm3, %v2675_v17 }
  0x25   : > { %593 = vst.msk [vmem:[#allocation3 + $0x78] sm:$0xff] %vm577_vm3, %v2675_v17  ;;  %594 = vst.msk [vmem:[#allocation4] sm:$0xff] %vm577_vm3, %v2676_v18 }
  0x26   : > { %2299 = vmatmul.mubr.msk.f32.gmra.mxu0 %vm362_vm1, %v343_v11  ;;  %2311 = vmatmul.mubr.msk.f32.gmra.mxu1 %vm362_vm1, %v351_v12  ;;  %595 = vst.msk [vmem:[#allocation4 + $0x8] sm:$0xff] %vm577_vm3, %v2676_v18  ;;  %596 = vst.msk [vmem:[#allocation4 + $0x10] sm:$0xff] %vm577_vm3, %v2676_v18 }
  0x27   : > { %2301 = vmatprep.mubr.msk.f32.mxu0 %vm362_vm1, %v344_v13  ;;  %2313 = vmatprep.mubr.msk.f32.mxu1 %vm362_vm1, %v352_v14  ;;  %597 = vst.msk [vmem:[#allocation4 + $0x18] sm:$0xff] %vm577_vm3, %v2676_v18  ;;  %598 = vst.msk [vmem:[#allocation4 + $0x20] sm:$0xff] %vm577_vm3, %v2676_v18 }
  0x28   : > { %599 = vst.msk [vmem:[#allocation4 + $0x28] sm:$0xff] %vm577_vm3, %v2676_v18  ;;  %600 = vst.msk [vmem:[#allocation4 + $0x30] sm:$0xff] %vm577_vm3, %v2676_v18 }
  0x29   : > { %601 = vst.msk [vmem:[#allocation4 + $0x38] sm:$0xff] %vm577_vm3, %v2676_v18  ;;  %602 = vst.msk [vmem:[#allocation4 + $0x40] sm:$0xff] %vm577_vm3, %v2676_v18 }
  0x2a   : > { %2302 = vmatmul.mubr.msk.f32.gmra.mxu0 %vm362_vm1, %v345_v15  ;;  %2314 = vmatmul.mubr.msk.f32.gmra.mxu1 %vm362_vm1, %v353_v16  ;;  %603 = vst.msk [vmem:[#allocation4 + $0x48] sm:$0xff] %vm577_vm3, %v2676_v18  ;;  %604 = vst.msk [vmem:[#allocation4 + $0x50] sm:$0xff] %vm577_vm3, %v2676_v18 }
  0x2b   : > { %605 = vst.msk [vmem:[#allocation4 + $0x58] sm:$0xff] %vm577_vm3, %v2676_v18  ;;  %606 = vst.msk [vmem:[#allocation4 + $0x60] sm:$0xff] %vm577_vm3, %v2676_v18 }
  0x2c   : > { %607 = vst.msk [vmem:[#allocation4 + $0x68] sm:$0xff] %vm577_vm3, %v2676_v18  ;;  %608 = vst.msk [vmem:[#allocation4 + $0x70] sm:$0xff] %vm577_vm3, %v2676_v18 }
  0x2d   : > { %609 = vst.msk [vmem:[#allocation4 + $0x78] sm:$0xff] %vm577_vm3, %v2676_v18 }
  0x2e   : > { %610 = vst.msk [vmem:[#allocation5] sm:$0xff] %vm560_vm2, %v2676_v18  ;;  %611 = vst.msk [vmem:[#allocation5 + $0x8] sm:$0xff] %vm560_vm2, %v2676_v18 }
  0x2f   : > { %612 = vst.msk [vmem:[#allocation5 + $0x10] sm:$0xff] %vm560_vm2, %v2676_v18  ;;  %613 = vst.msk [vmem:[#allocation5 + $0x18] sm:$0xff] %vm560_vm2, %v2676_v18 }
  0x30   : > { %614 = vst.msk [vmem:[#allocation5 + $0x20] sm:$0xff] %vm560_vm2, %v2676_v18  ;;  %615 = vst.msk [vmem:[#allocation5 + $0x28] sm:$0xff] %vm560_vm2, %v2676_v18 }
  0x31   : > { %616 = vst.msk [vmem:[#allocation5 + $0x30] sm:$0xff] %vm560_vm2, %v2676_v18  ;;  %617 = vst.msk [vmem:[#allocation5 + $0x38] sm:$0xff] %vm560_vm2, %v2676_v18 }
  0x32   : > { %618 = vst.msk [vmem:[#allocation5 + $0x40] sm:$0xff] %vm560_vm2, %v2676_v18  ;;  %619 = vst.msk [vmem:[#allocation5 + $0x48] sm:$0xff] %vm560_vm2, %v2676_v18 }
  0x33   : > { %620 = vst.msk [vmem:[#allocation5 + $0x50] sm:$0xff] %vm560_vm2, %v2676_v18  ;;  %621 = vst.msk [vmem:[#allocation5 + $0x58] sm:$0xff] %vm560_vm2, %v2676_v18 }
  0x34   : > { %622 = vst.msk [vmem:[#allocation5 + $0x60] sm:$0xff] %vm560_vm2, %v2676_v18  ;;  %623 = vst.msk [vmem:[#allocation5 + $0x68] sm:$0xff] %vm560_vm2, %v2676_v18 }
  0x35   : > { %624 = vst.msk [vmem:[#allocation5 + $0x70] sm:$0xff] %vm560_vm2, %v2676_v18  ;;  %625 = vst.msk [vmem:[#allocation5 + $0x78] sm:$0xff] %vm560_vm2, %v2676_v18 }
  0xde   : > { %v2294_v20 = vpop.f32.mrf.mxu0  ;;  %v2306_v21 = vpop.f32.mrf.mxu1 }
  0xdf   : > { %v487_v22 = vadd.f32 %v2294_v20, %v2121_v19  ;;  %v527_v23 = vadd.f32 %v2306_v21, %v2121_v19 }
  0xe0   : > { %v481_v24 = vpop.f32.mrf.mxu0  ;;  %v521_v25 = vpop.f32.mrf.mxu1 }
  0xe1   : > { %562 = vst.msk [vmem:[#allocation2 + $0x8] sm:$0xff] %vm560_vm2, %v487_v22  ;;  %570 = vst.msk [vmem:[#allocation2 + $0x48] sm:$0xff] %vm560_vm2, %v527_v23  ;;  %v482_v26 = vadd.f32 %v2121_v19, %v481_v24  ;;  %v522_v27 = vadd.f32 %v2121_v19, %v521_v25 }
  0xe2   : > { %v2297_v28 = vpop.f32.mrf.mxu0  ;;  %v2309_v29 = vpop.f32.mrf.mxu1 }
  0xe3   : > { %561 = vst.msk [vmem:[#allocation2] sm:$0xff] %vm560_vm2, %v482_v26  ;;  %569 = vst.msk [vmem:[#allocation2 + $0x40] sm:$0xff] %vm560_vm2, %v522_v27  ;;  %v497_v30 = vadd.f32 %v2297_v28, %v2121_v19  ;;  %v537_v31 = vadd.f32 %v2309_v29, %v2121_v19 }
  0xe4   : > { %v491_v32 = vpop.f32.mrf.mxu0  ;;  %v531_v33 = vpop.f32.mrf.mxu1 }
  0xe5   : > { %564 = vst.msk [vmem:[#allocation2 + $0x18] sm:$0xff] %vm560_vm2, %v497_v30  ;;  %572 = vst.msk [vmem:[#allocation2 + $0x58] sm:$0xff] %vm560_vm2, %v537_v31  ;;  %v492_v34 = vadd.f32 %v2121_v19, %v491_v32  ;;  %v532_v35 = vadd.f32 %v2121_v19, %v531_v33 }
  0xe6   : > { %v2300_v36 = vpop.f32.mrf.mxu0  ;;  %v2312_v37 = vpop.f32.mrf.mxu1 }
  0xe7   : > { %563 = vst.msk [vmem:[#allocation2 + $0x10] sm:$0xff] %vm560_vm2, %v492_v34  ;;  %571 = vst.msk [vmem:[#allocation2 + $0x50] sm:$0xff] %vm560_vm2, %v532_v35  ;;  %v507_v38 = vadd.f32 %v2300_v36, %v2121_v19  ;;  %v547_v39 = vadd.f32 %v2312_v37, %v2121_v19 }
  0xe8   : > { %v501_v40 = vpop.f32.mrf.mxu0  ;;  %v541_v41 = vpop.f32.mrf.mxu1 }
  0xe9   : > { %566 = vst.msk [vmem:[#allocation2 + $0x28] sm:$0xff] %vm560_vm2, %v507_v38  ;;  %574 = vst.msk [vmem:[#allocation2 + $0x68] sm:$0xff] %vm560_vm2, %v547_v39  ;;  %v502_v42 = vadd.f32 %v2121_v19, %v501_v40  ;;  %v542_v43 = vadd.f32 %v2121_v19, %v541_v41 }
  0xea   : > { %v2303_v44 = vpop.f32.mrf.mxu0  ;;  %v2315_v45 = vpop.f32.mrf.mxu1 }
  0xeb   : > { %565 = vst.msk [vmem:[#allocation2 + $0x20] sm:$0xff] %vm560_vm2, %v502_v42  ;;  %573 = vst.msk [vmem:[#allocation2 + $0x60] sm:$0xff] %vm560_vm2, %v542_v43  ;;  %v517_v46 = vadd.f32 %v2303_v44, %v2121_v19  ;;  %v557_v47 = vadd.f32 %v2315_v45, %v2121_v19 }
  0xec   : > { %v511_v48 = vpop.f32.mrf.mxu0  ;;  %v551_v49 = vpop.f32.mrf.mxu1 }
  0xed   : > { %568 = vst.msk [vmem:[#allocation2 + $0x38] sm:$0xff] %vm560_vm2, %v517_v46  ;;  %576 = vst.msk [vmem:[#allocation2 + $0x78] sm:$0xff] %vm560_vm2, %v557_v47  ;;  %v512_v50 = vadd.f32 %v2121_v19, %v511_v48  ;;  %v552_v51 = vadd.f32 %v2121_v19, %v551_v49 }
  0xef   : > { %567 = vst.msk [vmem:[#allocation2 + $0x30] sm:$0xff] %vm560_vm2, %v512_v50  ;;  %575 = vst.msk [vmem:[#allocation2 + $0x70] sm:$0xff] %vm560_vm2, %v552_v51 }
  0xf0 PF: > { %v641_v52 = vld [vmem:[%s2773_s23 + $0x78] sm:$0xff]  ;;  %vm658_vm4 = vcmask 15360   ;;  %v640_v53 = vld [vmem:[%s2773_s23 + $0x70] sm:$0xff]  ;;  %s2677_s11 = smov 126   ;;  %v639_v54 = vld [vmem:[%s2773_s23 + $0x68] sm:$0xff]  ;;  %v2678_v33 = vmov 0  }
  0xf1   : > { %2316 = vmatprep.subr.msk.mxu0 %vm658_vm4, %v641_v52  ;;  %1377 = vrot.lane.b32.xlu1 %v640_v53, %s2677_s11  ;;  %v642_v55 = vld [vmem:[#allocation2] sm:$0xff]  ;;  %v636_v56 = vld [vmem:[%s2773_s23 + $0x50] sm:$0xff]  ;;  %v637_v58 = vld [vmem:[%s2773_s23 + $0x58] sm:$0xff]  ;;  %vm1220_vm5 = vcmask 7168   ;;  %p2171_p10 = scmp.ne.s32.totalorder %s2649_s21, 1 }
  0xf2   : > { %2317 = vmatpush3.xpose.msk.msra.mxu0 %vm658_vm4, %v641_v52  ;;  %1379 = vrot.lane.b32.xlu0 %v641_v52, %s2677_s11  ;;  %v638_v57 = vld [vmem:[%s2773_s23 + $0x60] sm:$0xff]  ;;  %v2903_v59 = vld [vmem:[%s2773_s23 + $0x48] sm:$0xff]  ;;  %v2916_v61 = vld [vmem:[%s2773_s23 + $0x38] sm:$0xff] }
  0xf3   : > { %2318 = vmatprep.subr.msk.mxu0 %vm658_vm4, %v640_v53  ;;  %2348 = vmatprep.mubr.msk.f32.mxu0 %vm658_vm4, %v642_v55  ;;  %v2909_v60 = vld [vmem:[%s2773_s23 + $0x40] sm:$0xff]  ;;  %v2923_v62 = vld [vmem:[%s2773_s23 + $0x30] sm:$0xff]  ;;  %v2930_v63 = vld [vmem:[%s2773_s23 + $0x28] sm:$0xff] }
  0xf4   : > { %v2937_v0 = vld [vmem:[%s2773_s23 + $0x20] sm:$0xff]  ;;  %v2944_v1 = vld [vmem:[%s2773_s23 + $0x18] sm:$0xff]  ;;  %v2951_v2 = vld [vmem:[%s2773_s23 + $0x10] sm:$0xff]  ;;  %2519 = vset.pattern.permute.xlu1 %v2678_v33  ;;  %2520 = vset.pattern.permute.xlu0 %v2678_v33 }
  0xf5   : > { %1375 = vrot.lane.b32.xlu1 %v639_v54, %s2677_s11  ;;  %v2958_v3 = vld [vmem:[%s2773_s23 + $0x8] sm:$0xff]  ;;  %v2965_v4 = vld [vmem:[%s2773_s23] sm:$0xff]  ;;  %v644_v6 = vld [vmem:[#allocation2 + $0x10] sm:$0xff] }
  0xf6   : > { %2319 = vmatpush3.xpose.msk.msra.mxu0 %vm658_vm4, %v640_v53  ;;  %1369 = vrot.lane.b32.xlu0 %v636_v56, %s2677_s11  ;;  %v643_v5 = vld [vmem:[#allocation2 + $0x8] sm:$0xff]  ;;  %v645_v7 = vld [vmem:[#allocation2 + $0x18] sm:$0xff]  ;;  %v646_v8 = vld [vmem:[#allocation2 + $0x20] sm:$0xff] }
  0xf7   : > { %2320 = vmatprep.subr.msk.mxu0 %vm658_vm4, %v639_v54  ;;  %v647_v9 = vld [vmem:[#allocation2 + $0x28] sm:$0xff]  ;;  %v648_v10 = vld [vmem:[#allocation2 + $0x30] sm:$0xff]  ;;  %v649_v11 = vld [vmem:[#allocation2 + $0x38] sm:$0xff] }
  0xf8   : > { %v650_v12 = vld [vmem:[#allocation2 + $0x40] sm:$0xff]  ;;  %v651_v13 = vld [vmem:[#allocation2 + $0x48] sm:$0xff]  ;;  %v652_v14 = vld [vmem:[#allocation2 + $0x50] sm:$0xff] }
  0xf9   : > { %1373 = vrot.lane.b32.xlu1 %v638_v57, %s2677_s11  ;;  %v653_v15 = vld [vmem:[#allocation2 + $0x58] sm:$0xff]  ;;  %v654_v16 = vld [vmem:[#allocation2 + $0x60] sm:$0xff]  ;;  %v655_v17 = vld [vmem:[#allocation2 + $0x68] sm:$0xff] }
  0xfa   : > { %2321 = vmatpush3.xpose.msk.msra.mxu0 %vm658_vm4, %v639_v54  ;;  %v656_v18 = vld [vmem:[#allocation2 + $0x70] sm:$0xff]  ;;  %v657_v19 = vld [vmem:[#allocation2 + $0x78] sm:$0xff]  ;;  %v901_v43 = vld [vmem:[#allocation3 + $0x8] sm:$0xff] }
  0xfb   : > { %2322 = vmatprep.subr.msk.mxu0 %vm658_vm4, %v638_v57  ;;  %v3044_v46 = vld [vmem:[#allocation3] sm:$0xff]  ;;  %v3046_v47 = vld [vmem:[#allocation3 + $0x18] sm:$0xff]  ;;  %v3055_v52 = vld [vmem:[#allocation3 + $0x10] sm:$0xff] }
  0xfd   : > { %1371 = vrot.lane.b32.xlu1 %v637_v58, %s2677_s11 }
  0xfe   : > { %2323 = vmatpush3.xpose.msk.msra.mxu0 %vm658_vm4, %v638_v57 }
  0xff   : > { %2324 = vmatprep.subr.msk.mxu0 %vm658_vm4, %v637_v58 }
 0x102   : > { %2325 = vmatpush3.xpose.msk.msra.mxu0 %vm658_vm4, %v637_v58  ;;  %v905_v58 = vld [vmem:[#allocation3 + $0x28] sm:$0xff] }
 0x103   : > { %2326 = vmatprep.subr.msk.mxu0 %vm658_vm4, %v636_v56 }
 0x106   : > { %2327 = vmatpush3.xpose.msk.msra.mxu0 %vm658_vm4, %v636_v56 }
 0x107   : > { %2328 = vmatprep.subr.msk.mxu0 %vm658_vm4, %v2903_v59 }
 0x10a   : > { %2329 = vmatpush3.xpose.msk.msra.mxu0 %vm658_vm4, %v2903_v59 }
 0x10b   : > { %2330 = vmatprep.subr.msk.mxu0 %vm658_vm4, %v2909_v60 }
 0x10e   : > { %2331 = vmatpush3.xpose.msk.msra.mxu0 %vm658_vm4, %v2909_v60 }
 0x10f   : > { %2332 = vmatprep.subr.msk.mxu0 %vm658_vm4, %v2916_v61 }
 0x112   : > { %2333 = vmatpush3.xpose.msk.msra.mxu0 %vm658_vm4, %v2916_v61 }
 0x113   : > { %2334 = vmatprep.subr.msk.mxu0 %vm658_vm4, %v2923_v62 }
 0x116   : > { %2335 = vmatpush3.xpose.msk.msra.mxu0 %vm658_vm4, %v2923_v62 }
 0x117   : > { %2336 = vmatprep.subr.msk.mxu0 %vm658_vm4, %v2930_v63 }
 0x11a   : > { %2337 = vmatpush3.xpose.msk.msra.mxu0 %vm658_vm4, %v2930_v63 }
 0x11b   : > { %2338 = vmatprep.subr.msk.mxu0 %vm658_vm4, %v2937_v0 }
 0x11e   : > { %2339 = vmatpush3.xpose.msk.msra.mxu0 %vm658_vm4, %v2937_v0 }
 0x11f   : > { %2340 = vmatprep.subr.msk.mxu0 %vm658_vm4, %v2944_v1 }
 0x122   : > { %2341 = vmatpush3.xpose.msk.msra.mxu0 %vm658_vm4, %v2944_v1 }
 0x123   : > { %2342 = vmatprep.subr.msk.mxu0 %vm658_vm4, %v2951_v2 }
 0x126   : > { %2343 = vmatpush3.xpose.msk.msra.mxu0 %vm658_vm4, %v2951_v2 }
 0x127   : > { %2344 = vmatprep.subr.msk.mxu0 %vm658_vm4, %v2958_v3 }
 0x12a   : > { %2345 = vmatpush3.xpose.msk.msra.mxu0 %vm658_vm4, %v2958_v3 }
 0x12b   : > { %2346 = vmatprep.subr.msk.mxu0 %vm658_vm4, %v2965_v4 }
 0x12e   : > { %2347 = vmatpush3.xpose.msk.msra.mxu0 %vm658_vm4, %v2965_v4 }
 0x131   : > { %2349 = vmatmul.mubr.msk.f32.vlgmr.msra.gmra.mxu0 %vm658_vm4, %v643_v5 }
 0x132   : > { %2351 = vmatprep.mubr.msk.f32.mxu0 %vm658_vm4, %v644_v6 }
 0x135   : > { %2352 = vmatmul.mubr.msk.f32.gmra.mxu0 %vm658_vm4, %v645_v7  ;;  %v909_v7 = vld [vmem:[#allocation3 + $0x48] sm:$0xff] }
 0x136   : > { %2354 = vmatprep.mubr.msk.f32.mxu0 %vm658_vm4, %v646_v8 }
 0x139   : > { %2355 = vmatmul.mubr.msk.f32.gmra.mxu0 %vm658_vm4, %v647_v9 }
 0x13a   : > { %2357 = vmatprep.mubr.msk.f32.mxu0 %vm658_vm4, %v648_v10  ;;  %v911_v10 = vld [vmem:[#allocation3 + $0x58] sm:$0xff] }
 0x13d   : > { %2358 = vmatmul.mubr.msk.f32.gmra.mxu0 %vm658_vm4, %v649_v11 }
 0x13e   : > { %2360 = vmatprep.mubr.msk.f32.mxu0 %vm658_vm4, %v650_v12 }
 0x141   : > { %2361 = vmatmul.mubr.msk.f32.gmra.mxu0 %vm658_vm4, %v651_v13 }
 0x142   : > { %2363 = vmatprep.mubr.msk.f32.mxu0 %vm658_vm4, %v652_v14 }
 0x145   : > { %2364 = vmatmul.mubr.msk.f32.gmra.mxu0 %vm658_vm4, %v653_v15 }
 0x146   : > { %2366 = vmatprep.mubr.msk.f32.mxu0 %vm658_vm4, %v654_v16 }
 0x149   : > { %2367 = vmatmul.mubr.msk.f32.gmra.mxu0 %vm658_vm4, %v655_v17  ;;  %v3099_v17 = vld [vmem:[#allocation3 + $0x78] sm:$0xff] }
 0x14a   : > { %2369 = vmatprep.mubr.msk.f32.mxu0 %vm658_vm4, %v656_v18 }
 0x14d   : > { %2370 = vmatmul.mubr.msk.f32.gmra.mxu0 %vm658_vm4, %v657_v19 }
 0x163   : > { %v1378_v20 = vpop.permute.xlu1 %1377 }
 0x164   : > { %v1380_v21 = vpop.permute.xlu0 %1379 }
 0x165   : > { %2372 = vmatprep.subr.mxu1 %v1380_v21 }
 0x166   : > { %2373 = vmatpush3.msra.mxu1 %v1380_v21 }
 0x167   : > { %v1376_v22 = vpop.permute.xlu1 %1375  ;;  %2374 = vmatprep.subr.mxu1 %v1378_v20 }
 0x168   : > { %2375 = vmatpush3.msra.mxu1 %v1378_v20  ;;  %v1370_v25 = vpop.permute.xlu0 %1369 }
 0x169   : > { %2376 = vmatprep.subr.mxu1 %v1376_v22 }
 0x16a   : > { %2377 = vmatpush3.msra.mxu1 %v1376_v22 }
 0x16b   : > { %v1374_v23 = vpop.permute.xlu1 %1373 }
 0x16c   : > { %2378 = vmatprep.subr.mxu1 %v1374_v23 }
 0x16d   : > { %2379 = vmatpush3.msra.mxu1 %v1374_v23 }
 0x16f   : > { %v1372_v24 = vpop.permute.xlu1 %1371 }
 0x170   : > { %2380 = vmatprep.subr.mxu1 %v1372_v24 }
 0x171   : > { %2381 = vmatpush3.msra.mxu1 %v1372_v24 }
 0x172   : > { %2382 = vmatprep.subr.mxu1 %v1370_v25 }
 0x173   : > { %2383 = vmatpush3.msra.mxu1 %v1370_v25 }
 0x1f1   : > { %v2988_v26 = vpop.f32.mrf.mxu0 }
 0x1f2   : > { %918 = vmax.xlane.f32.xlu0 %v2988_v26 }
 0x1f3   : > { %v2991_v27 = vpop.f32.mrf.mxu0 }
 0x1f5   : > { %v2993_v28 = vpop.f32.mrf.mxu0 }
 0x1f6   : > { %916 = vmax.xlane.f32.xlu0 %v2991_v27  ;;  %922 = vmax.xlane.f32.xlu1 %v2993_v28 }
 0x1f7   : > { %v2997_v29 = vpop.f32.mrf.mxu0 }
 0x1f9   : > { %v2999_v30 = vpop.f32.mrf.mxu0 }
 0x1fa   : > { %920 = vmax.xlane.f32.xlu1 %v2997_v29 }
 0x1fb   : > { %v3002_v31 = vpop.f32.mrf.mxu0 }
 0x1fd   : > { %v3004_v32 = vpop.f32.mrf.mxu0 }
 0x1fe   : > { %926 = vmax.xlane.f32.xlu1 %v2999_v30 }
 0x1ff   : > { %v3007_v34 = vpop.f32.mrf.mxu0 }
 0x201   : > { %v3009_v35 = vpop.f32.mrf.mxu0 }
 0x202   : > { %930 = vmax.xlane.f32.xlu1 %v3004_v32 }
 0x203   : > { %v3012_v36 = vpop.f32.mrf.mxu0 }
 0x205   : > { %v3014_v37 = vpop.f32.mrf.mxu0 }
 0x206   : > { %934 = vmax.xlane.f32.xlu1 %v3009_v35 }
 0x207   : > { %v3017_v38 = vpop.f32.mrf.mxu0 }
 0x209   : > { %v3019_v39 = vpop.f32.mrf.mxu0 }
 0x20a   : > { %938 = vmax.xlane.f32.xlu1 %v3014_v37 }
 0x20b   : > { %v3022_v40 = vpop.f32.mrf.mxu0 }
 0x20c   : > { %1367 = vrot.lane.b32.xlu0 %v2903_v59, %s2677_s11 }
 0x20d   : > { %v3027_v41 = vpop.f32.mrf.mxu0 }
 0x20e   : > { %942 = vmax.xlane.f32.xlu1 %v3019_v39 }
 0x20f   : > { %v3035_v42 = vpop.f32.mrf.mxu0 }
 0x212   : > { %946 = vmax.xlane.f32.xlu1 %v3027_v41 }
 0x22b   : > { %924 = vmax.xlane.f32.xlu0 %v3002_v31 }
 0x22f   : > { %928 = vmax.xlane.f32.xlu0 %v3007_v34 }
 0x233   : > { %932 = vmax.xlane.f32.xlu0 %v3012_v36 }
 0x237   : > { %936 = vmax.xlane.f32.xlu0 %v3017_v38 }
 0x23b   : > { %940 = vmax.xlane.f32.xlu0 %v3022_v40 }
 0x23f   : > { %944 = vmax.xlane.f32.xlu0 %v3035_v42 }
 0x255   : > { %1365 = vrot.lane.b32.xlu0 %v2909_v60, %s2677_s11 }
 0x259   : > { %1363 = vrot.lane.b32.xlu0 %v2916_v61, %s2677_s11 }
 0x25d   : > { %1361 = vrot.lane.b32.xlu0 %v2923_v62, %s2677_s11  ;;  %v907_v62 = vld [vmem:[#allocation3 + $0x38] sm:$0xff] }
 0x27b   : > { %v919_v44 = vpop.xlane.xlu0 %918 }
 0x27c   : > { %v949_v45 = vmax.f32 %v901_v43, %v919_v44 }
 0x27e   : > { %1575 = vst.msk [vmem:[#allocation3 + $0x8] sm:$0xff] %vm1220_vm5, %v949_v45  ;;  %1019 = vperm.xlu1 %2519, %v949_v45   ;;  %v965_v8 = vsub.f32 %v901_v43, %v949_v45 }
 0x27f   : > { %v917_v48 = vpop.xlane.xlu0 %916  ;;  %v923_v49 = vpop.xlane.xlu1 %922 }
 0x280   : > { %v3050_v50 = vmax.f32 %v3044_v46, %v917_v48  ;;  %v3053_v51 = vmax.f32 %v3046_v47, %v923_v49  ;;  %v982_v12 = vmul.f32 1.442695, %v965_v8  ;;  %v904_v48 = vld [vmem:[#allocation3 + $0x20] sm:$0xff]  ;;  %v910_v8 = vld [vmem:[#allocation3 + $0x50] sm:$0xff] }
 0x282   : > { %v964_v53 = vsub.f32 %v3044_v46, %v3050_v50  ;;  %1574 = vst.msk [vmem:[#allocation3] sm:$0xff] %vm1220_vm5, %v3050_v50  ;;  %v967_v54 = vsub.f32 %v3046_v47, %v3053_v51  ;;  %1577 = vst.msk [vmem:[#allocation3 + $0x18] sm:$0xff] %vm1220_vm5, %v3053_v51  ;;  %1029 = vperm.xlu1 %2519, %v3053_v51   ;;  %1014 = vperm.xlu0 %2520, %v3050_v50   ;;  %2521 = vpow2.f32 %v982_v12 }
 0x283   : > { %v1368_v55 = vpop.permute.xlu0 %1367  ;;  %v921_v56 = vpop.xlane.xlu1 %920 }
 0x284   : > { %v3068_v57 = vmax.f32 %v3055_v52, %v921_v56  ;;  %2384 = vmatprep.subr.mxu1 %v1368_v55  ;;  %v986_v50 = vmul.f32 1.442695, %v967_v54 }
 0x285   : > { %2385 = vmatpush3.msra.mxu1 %v1368_v55 }
 0x286   : > { %v966_v59 = vsub.f32 %v3055_v52, %v3068_v57  ;;  %1576 = vst.msk [vmem:[#allocation3 + $0x10] sm:$0xff] %vm1220_vm5, %v3068_v57  ;;  %1024 = vperm.xlu1 %2519, %v3068_v57   ;;  %1359 = vrot.lane.b32.xlu0 %v2930_v63, %s2677_s11 }
 0x287   : > { %v927_v60 = vpop.xlane.xlu1 %926 }
 0x288   : > { %v953_v61 = vmax.f32 %v905_v58, %v927_v60 }
 0x28a   : > { %1579 = vst.msk [vmem:[#allocation3 + $0x28] sm:$0xff] %vm1220_vm5, %v953_v61  ;;  %1039 = vperm.xlu1 %2519, %v953_v61   ;;  %1357 = vrot.lane.b32.xlu0 %v2937_v0, %s2677_s11  ;;  %v969_v11 = vsub.f32 %v905_v58, %v953_v61  ;;  %v906_v58 = vld [vmem:[#allocation3 + $0x30] sm:$0xff] }
 0x28b   : > { %v931_v5 = vpop.xlane.xlu1 %930 }
 0x28c   : > { %v3080_v6 = vmax.f32 %v907_v62, %v931_v5  ;;  %v990_v14 = vmul.f32 1.442695, %v969_v11  ;;  %v908_v5 = vld [vmem:[#allocation3 + $0x40] sm:$0xff] }
 0x28e   : > { %1355 = vrot.lane.b32.xlu0 %v2944_v1, %s2677_s11  ;;  %1581 = vst.msk [vmem:[#allocation3 + $0x38] sm:$0xff] %vm1220_vm5, %v3080_v6  ;;  %v913_v1 = vld [vmem:[#allocation3 + $0x68] sm:$0xff]  ;;  %v971_v15 = vsub.f32 %v907_v62, %v3080_v6  ;;  %2523 = vpow2.f32 %v990_v14  ;;  %v3138_v14 = vld [vmem:[#allocation3 + $0x70] sm:$0xff] }
 0x28f   : > { %v935_v63 = vpop.xlane.xlu1 %934  ;;  %v3114_v25 = vpop.eup %2521 }
 0x290   : > { %v3086_v9 = vmax.f32 %v909_v7, %v935_v63  ;;  %v994_v18 = vmul.f32 1.442695, %v971_v15  ;;  %v980_v15 = vmul.f32 1.442695, %v964_v53 }
 0x292   : > { %1353 = vrot.lane.b32.xlu0 %v2951_v2, %s2677_s11  ;;  %1583 = vst.msk [vmem:[#allocation3 + $0x48] sm:$0xff] %vm1220_vm5, %v3086_v9  ;;  %v973_v19 = vsub.f32 %v909_v7, %v3086_v9  ;;  %2525 = vpow2.f32 %v994_v18  ;;  %v984_v18 = vmul.f32 1.442695, %v966_v59 }
 0x293   : > { %v939_v0 = vpop.xlane.xlu1 %938 }
 0x294   : > { %v3092_v13 = vmax.f32 %v911_v10, %v939_v0  ;;  %v998_v21 = vmul.f32 1.442695, %v973_v19  ;;  %v912_v0 = vld [vmem:[#allocation3 + $0x60] sm:$0xff] }
 0x296   : > { %1351 = vrot.lane.b32.xlu0 %v2958_v3, %s2677_s11  ;;  %1585 = vst.msk [vmem:[#allocation3 + $0x58] sm:$0xff] %vm1220_vm5, %v3092_v13  ;;  %v975_v22 = vsub.f32 %v911_v10, %v3092_v13  ;;  %2527 = vpow2.f32 %v998_v21 }
 0x297   : > { %v943_v16 = vpop.xlane.xlu1 %942 }
 0x298   : > { %v961_v2 = vmax.f32 %v913_v1, %v943_v16  ;;  %v1002_v24 = vmul.f32 1.442695, %v975_v22 }
 0x29a   : > { %1349 = vrot.lane.b32.xlu0 %v2965_v4, %s2677_s11  ;;  %1587 = vst.msk [vmem:[#allocation3 + $0x68] sm:$0xff] %vm1220_vm5, %v961_v2  ;;  %v977_v4 = vsub.f32 %v913_v1, %v961_v2  ;;  %2529 = vpow2.f32 %v1002_v24 }
 0x29b   : > { %v947_v20 = vpop.xlane.xlu1 %946  ;;  %v3117_v43 = vpop.eup %2523 }
 0x29c   : > { %v3106_v3 = vmax.f32 %v3099_v17, %v947_v20  ;;  %v1006_v33 = vmul.f32 1.442695, %v977_v4 }
 0x29e   : > { %1079 = vperm.xlu0 %2520, %v961_v2   ;;  %v979_v23 = vsub.f32 %v3099_v17, %v3106_v3  ;;  %1589 = vst.msk [vmem:[#allocation3 + $0x78] sm:$0xff] %vm1220_vm5, %v3106_v3  ;;  %2531 = vpow2.f32 %v1006_v33 }
 0x29f   : > { %v3120_v44 = vpop.eup %2525  ;;  %2533 = vpow2.f32 %v980_v15 }
 0x2a0   : > { %2535 = vpow2.f32 %v984_v18 }
 0x2a1   : > { %2537 = vpow2.f32 %v986_v50 }
 0x2a2   : > { %1089 = vperm.xlu0 %2520, %v3106_v3  }
 0x2a3   : > { %v3123_v45 = vpop.eup %2527 }
 0x2a6   : > { %1260 = vperm.xlu0 %2520, %v3114_v25  }
 0x2a7   : > { %v3126_v49 = vpop.eup %2529 }
 0x2aa   : > { %1280 = vperm.xlu0 %2520, %v3117_v43  }
 0x2ab   : > { %v3129_v60 = vpop.eup %2531 }
 0x2ac   : > { %v3159_v59 = vpop.eup %2533 }
 0x2ad   : > { %v3162_v54 = vpop.eup %2535 }
 0x2ae   : > { %1290 = vperm.xlu0 %2520, %v3120_v44   ;;  %v3165_v24 = vpop.eup %2537 }
 0x2b2   : > { %1300 = vperm.xlu0 %2520, %v3123_v45  }
 0x2b4   : > { %v925_v55 = vpop.xlane.xlu0 %924 }
 0x2b5   : > { %v952_v56 = vmax.f32 %v904_v48, %v925_v55 }
 0x2b6   : > { %1310 = vperm.xlu0 %2520, %v3126_v49  }
 0x2b7   : > { %1578 = vst.msk [vmem:[#allocation3 + $0x20] sm:$0xff] %vm1220_vm5, %v952_v56  ;;  %1034 = vperm.xlu1 %2519, %v952_v56   ;;  %v968_v53 = vsub.f32 %v904_v48, %v952_v56 }
 0x2b8   : > { %v929_v61 = vpop.xlane.xlu0 %928 }
 0x2b9   : > { %v954_v62 = vmax.f32 %v906_v58, %v929_v61  ;;  %v988_v19 = vmul.f32 1.442695, %v968_v53 }
 0x2ba   : > { %1320 = vperm.xlu0 %2520, %v3129_v60  }
 0x2bb   : > { %1580 = vst.msk [vmem:[#allocation3 + $0x30] sm:$0xff] %vm1220_vm5, %v954_v62  ;;  %1049 = vperm.xlu1 %2519, %v3080_v6   ;;  %v970_v20 = vsub.f32 %v906_v58, %v954_v62  ;;  %2539 = vpow2.f32 %v988_v19 }
 0x2bc   : > { %v933_v7 = vpop.xlane.xlu0 %932 }
 0x2bd   : > { %v956_v63 = vmax.f32 %v908_v5, %v933_v7  ;;  %v992_v52 = vmul.f32 1.442695, %v970_v20 }
 0x2bf   : > { %1044 = vperm.xlu1 %2519, %v954_v62   ;;  %1582 = vst.msk [vmem:[#allocation3 + $0x40] sm:$0xff] %vm1220_vm5, %v956_v63  ;;  %v972_v57 = vsub.f32 %v908_v5, %v956_v63  ;;  %2541 = vpow2.f32 %v992_v52 }
 0x2c0   : > { %v937_v10 = vpop.xlane.xlu0 %936 }
 0x2c1   : > { %v958_v11 = vmax.f32 %v910_v8, %v937_v10  ;;  %v996_v47 = vmul.f32 1.442695, %v972_v57 }
 0x2c3   : > { %1059 = vperm.xlu1 %2519, %v3086_v9   ;;  %1584 = vst.msk [vmem:[#allocation3 + $0x50] sm:$0xff] %vm1220_vm5, %v958_v11  ;;  %v974_v51 = vsub.f32 %v910_v8, %v958_v11  ;;  %2543 = vpow2.f32 %v996_v47 }
 0x2c4   : > { %v941_v12 = vpop.xlane.xlu0 %940 }
 0x2c5   : > { %v960_v1 = vmax.f32 %v912_v0, %v941_v12  ;;  %v1000_v21 = vmul.f32 1.442695, %v974_v51 }
 0x2c7   : > { %1054 = vperm.xlu1 %2519, %v956_v63   ;;  %1586 = vst.msk [vmem:[#allocation3 + $0x60] sm:$0xff] %vm1220_vm5, %v960_v1  ;;  %v976_v22 = vsub.f32 %v912_v0, %v960_v1  ;;  %2545 = vpow2.f32 %v1000_v21 }
 0x2c8   : > { %v945_v6 = vpop.xlane.xlu0 %944  ;;  %v3168_v33 = vpop.eup %2539 }
 0x2c9   : > { %v3145_v16 = vmax.f32 %v3138_v14, %v945_v6  ;;  %v1004_v4 = vmul.f32 1.442695, %v976_v22 }
 0x2cb   : > { %1069 = vperm.xlu1 %2519, %v3092_v13   ;;  %v978_v9 = vsub.f32 %v3138_v14, %v3145_v16  ;;  %1588 = vst.msk [vmem:[#allocation3 + $0x70] sm:$0xff] %vm1220_vm5, %v3145_v16  ;;  %2547 = vpow2.f32 %v1004_v4 }
 0x2cc   : > { %v1366_v2 = vpop.permute.xlu0 %1365  ;;  %v3171_v48 = vpop.eup %2541 }
 0x2cd   : > { %2386 = vmatprep.subr.mxu1 %v1366_v2 }
 0x2ce   : > { %2387 = vmatpush3.msra.mxu1 %v1366_v2 }
 0x2cf   : > { %1064 = vperm.xlu1 %2519, %v958_v11  }
 0x2d0   : > { %v1364_v46 = vpop.permute.xlu0 %1363  ;;  %v3174_v55 = vpop.eup %2543 }
 0x2d1   : > { %2388 = vmatprep.subr.mxu1 %v1364_v46 }
 0x2d2   : > { %2389 = vmatpush3.msra.mxu1 %v1364_v46 }
 0x2d3   : > { %1074 = vperm.xlu1 %2519, %v960_v1  }
 0x2d4   : > { %v1362_v13 = vpop.permute.xlu0 %1361  ;;  %v3177_v56 = vpop.eup %2545 }
 0x2d5   : > { %2390 = vmatprep.subr.mxu1 %v1362_v13 }
 0x2d6   : > { %2391 = vmatpush3.msra.mxu1 %v1362_v13 }
 0x2d7   : > { %1084 = vperm.xlu1 %2519, %v3145_v16  }
 0x2d8   : > { %v3180_v58 = vpop.eup %2547 }
 0x2db   : > { %1255 = vperm.xlu1 %2519, %v3159_v59  }
 0x2df   : > { %1265 = vperm.xlu1 %2519, %v3162_v54  }
 0x2e3   : > { %1270 = vperm.xlu1 %2519, %v3165_v24  }
 0x2e7   : > { %1275 = vperm.xlu1 %2519, %v3168_v33  }
 0x2eb   : > { %1285 = vperm.xlu1 %2519, %v3171_v48  }
 0x2ef   : > { %1295 = vperm.xlu1 %2519, %v3174_v55  }
 0x2f3   : > { %1305 = vperm.xlu1 %2519, %v3177_v56  }
 0x2f7   : > { %1315 = vperm.xlu1 %2519, %v3180_v58  }
 0x2f9   : > { %v1020_v61 = vpop.permute.xlu1 %1019 }
 0x2fa   : > { %v1093_v62 = vsub.f32 %v2988_v26, %v1020_v61 }
 0x2fc   : > { %v1110_v5 = vmul.f32 1.442695, %v1093_v62 }
 0x2fd   : > { %v1030_v7 = vpop.permute.xlu1 %1029  ;;  %v1015_v63 = vpop.permute.xlu0 %1014 }
 0x2fe   : > { %2549 = vpow2.f32 %v1110_v5  ;;  %v1095_v8 = vsub.f32 %v2993_v28, %v1030_v7  ;;  %v1092_v10 = vsub.f32 %v2991_v27, %v1015_v63 }
 0x300   : > { %v1114_v11 = vmul.f32 1.442695, %v1095_v8  ;;  %v1108_v0 = vmul.f32 1.442695, %v1092_v10 }
 0x301   : > { %v1025_v12 = vpop.permute.xlu1 %1024  ;;  %v1360_v1 = vpop.permute.xlu0 %1359 }
 0x302   : > { %2551 = vpow2.f32 %v1114_v11  ;;  %v1094_v6 = vsub.f32 %v2997_v29, %v1025_v12  ;;  %2392 = vmatprep.subr.mxu1 %v1360_v1 }
 0x303   : > { %2553 = vpow2.f32 %v1108_v0  ;;  %2393 = vmatpush3.msra.mxu1 %v1360_v1 }
 0x304   : > { %v1112_v15 = vmul.f32 1.442695, %v1094_v6 }
 0x305   : > { %v1040_v26 = vpop.permute.xlu1 %1039  ;;  %v1358_v2 = vpop.permute.xlu0 %1357 }
 0x306   : > { %2555 = vpow2.f32 %v1112_v15  ;;  %v1097_v18 = vsub.f32 %v2999_v30, %v1040_v26  ;;  %2394 = vmatprep.subr.mxu1 %v1358_v2 }
 0x307   : > { %2395 = vmatpush3.msra.mxu1 %v1358_v2 }
 0x308   : > { %v1118_v28 = vmul.f32 1.442695, %v1097_v18 }
 0x309   : > { %v1356_v27 = vpop.permute.xlu0 %1355 }
 0x30a   : > { %2557 = vpow2.f32 %v1118_v28  ;;  %2396 = vmatprep.subr.mxu1 %v1356_v27 }
 0x30b   : > { %v2550_v46 = vpop.eup %2549  ;;  %2397 = vmatpush3.msra.mxu1 %v1356_v27 }
 0x30c   : > { %1174 = vadd.xlane.f32.xlu0 %v2550_v46 }
 0x30d   : > { %v1354_v50 = vpop.permute.xlu0 %1353 }
 0x30e   : > { %2398 = vmatprep.subr.mxu1 %v1354_v50 }
 0x30f   : > { %v2552_v29 = vpop.eup %2551  ;;  %2399 = vmatpush3.msra.mxu1 %v1354_v50 }
 0x310   : > { %v2554_v53 = vpop.eup %2553  ;;  %1178 = vadd.xlane.f32.xlu0 %v2552_v29 }
 0x311   : > { %2404 = vmatprep.mubr.f32.mxu1 %v2554_v53  ;;  %v1352_v13 = vpop.permute.xlu0 %1351 }
 0x312   : > { %2400 = vmatprep.subr.mxu1 %v1352_v13 }
 0x313   : > { %v2556_v19 = vpop.eup %2555  ;;  %2401 = vmatpush3.msra.mxu1 %v1352_v13 }
 0x314   : > { %1176 = vadd.xlane.f32.xlu0 %v2556_v19 }
 0x315   : > { %v1350_v30 = vpop.permute.xlu0 %1349 }
 0x316   : > { %2402 = vmatprep.subr.mxu1 %v1350_v30 }
 0x317   : > { %v2558_v20 = vpop.eup %2557  ;;  %2403 = vmatpush3.msra.mxu1 %v1350_v30 }
 0x318   : > { %1182 = vadd.xlane.f32.xlu0 %v2558_v20  ;;  %2405 = vmatmul.mubr.f32.vlgmr.msra.gmra.mxu1 %v2550_v46 }
 0x319   : > { %2407 = vmatprep.mubr.f32.mxu1 %v2556_v19  ;;  %v1080_v10 = vpop.permute.xlu0 %1079 }
 0x31a   : > { %v1105_v1 = vsub.f32 %v3019_v39, %v1080_v10  ;;  %v1143_v10 = vld [vmem:[#allocation4 + $0x18] sm:$0xff] }
 0x31b   : > { %1172 = vadd.xlane.f32.xlu1 %v2554_v53 }
 0x31c   : > { %2408 = vmatmul.mubr.f32.gmra.mxu1 %v2552_v29  ;;  %v1134_v2 = vmul.f32 1.442695, %v1105_v1 }
 0x31d   : > { %v1090_v6 = vpop.permute.xlu0 %1089 }
 0x31e   : > { %v1107_v18 = vsub.f32 %v3027_v41, %v1090_v6 }
 0x320   : > { %v1138_v46 = vmul.f32 1.442695, %v1107_v18 }
 0x332   : > { %v1035_v52 = vpop.permute.xlu1 %1034 }
 0x333   : > { %v1096_v57 = vsub.f32 %v3002_v31, %v1035_v52  ;;  %v1008_v52 = vmul.f32 1.442695, %v978_v9 }
 0x335   : > { %v1116_v47 = vmul.f32 1.442695, %v1096_v57  ;;  %v1010_v57 = vmul.f32 1.442695, %v979_v23 }
 0x336   : > { %v1050_v51 = vpop.permute.xlu1 %1049 }
 0x337   : > { %2559 = vpow2.f32 %v1116_v47  ;;  %v1099_v21 = vsub.f32 %v3004_v32, %v1050_v51  ;;  %v1261_v47 = vpop.permute.xlu0 %1260 }
 0x339   : > { %v1122_v22 = vmul.f32 1.442695, %v1099_v21 }
 0x33a   : > { %v1045_v4 = vpop.permute.xlu1 %1044 }
 0x33b   : > { %2561 = vpow2.f32 %v1122_v22  ;;  %v1098_v61 = vsub.f32 %v3007_v34, %v1045_v4  ;;  %v3211_v14 = vpop.permute.xlu0 %1280 }
 0x33d   : > { %v1120_v62 = vmul.f32 1.442695, %v1098_v61 }
 0x33e   : > { %v1060_v5 = vpop.permute.xlu1 %1059 }
 0x33f   : > { %2563 = vpow2.f32 %v1120_v62  ;;  %v1101_v7 = vsub.f32 %v3009_v35, %v1060_v5  ;;  %v3215_v9 = vpop.permute.xlu0 %1290  ;;  %v1141_v5 = vld [vmem:[#allocation4 + $0x8] sm:$0xff] }
 0x341   : > { %v1126_v63 = vmul.f32 1.442695, %v1101_v7 }
 0x342   : > { %v1055_v8 = vpop.permute.xlu1 %1054 }
 0x343   : > { %2565 = vpow2.f32 %v1126_v63  ;;  %v1100_v31 = vsub.f32 %v3012_v36, %v1055_v8  ;;  %v3217_v3 = vpop.permute.xlu0 %1300  ;;  %v1157_v63 = vmul.f32 %v3114_v25, %v1141_v5  ;;  %v1239_v5 = vld [vmem:[#allocation5 + $0x10] sm:$0xff] }
 0x344   : > { %v2560_v11 = vpop.eup %2559 }
 0x345   : > { %v1124_v0 = vmul.f32 1.442695, %v1100_v31  ;;  %1180 = vadd.xlane.f32.xlu1 %v2560_v11  ;;  %2410 = vmatprep.mubr.f32.mxu1 %v2560_v11  ;;  %v1159_v11 = vmul.f32 %v3165_v24, %v1143_v10  ;;  %v1148_v10 = vld [vmem:[#allocation4 + $0x40] sm:$0xff] }
 0x346   : > { %v1070_v32 = vpop.permute.xlu1 %1069  ;;  %2411 = vmatmul.mubr.f32.gmra.mxu1 %v2558_v20 }
 0x347   : > { %2567 = vpow2.f32 %v1124_v0  ;;  %v1103_v34 = vsub.f32 %v3014_v37, %v1070_v32  ;;  %v3221_v4 = vpop.permute.xlu0 %1310  ;;  %v1142_v32 = vld [vmem:[#allocation4 + $0x10] sm:$0xff] }
 0x348   : > { %v2562_v12 = vpop.eup %2561  ;;  %v1158_v1 = vmul.f32 %v3162_v54, %v1142_v32  ;;  %v1144_v54 = vld [vmem:[#allocation4 + $0x20] sm:$0xff]  ;;  %v1164_v32 = vmul.f32 %v3174_v55, %v1148_v10 }
 0x349   : > { %v1130_v35 = vmul.f32 1.442695, %v1103_v34  ;;  %1186 = vadd.xlane.f32.xlu0 %v2562_v12 }
 0x34a   : > { %v1065_v15 = vpop.permute.xlu1 %1064 }
 0x34b   : > { %2569 = vpow2.f32 %v1130_v35  ;;  %v1102_v26 = vsub.f32 %v3017_v38, %v1065_v15  ;;  %v3225_v62 = vpop.permute.xlu0 %1320  ;;  %v1145_v35 = vld [vmem:[#allocation4 + $0x28] sm:$0xff] }
 0x34c   : > { %v2564_v36 = vpop.eup %2563 }
 0x34d   : > { %v1128_v28 = vmul.f32 1.442695, %v1102_v26  ;;  %1184 = vadd.xlane.f32.xlu1 %v2564_v36  ;;  %2413 = vmatprep.mubr.f32.mxu1 %v2564_v36  ;;  %v1161_v26 = vmul.f32 %v3117_v43, %v1145_v35  ;;  %v1140_v36 = vld [vmem:[#allocation4] sm:$0xff] }
 0x34e   : > { %v1075_v27 = vpop.permute.xlu1 %1074  ;;  %2414 = vmatmul.mubr.f32.gmra.mxu1 %v2562_v12  ;;  %v1156_v18 = vmul.f32 %v3159_v59, %v1140_v36  ;;  %v1238_v59 = vld [vmem:[#allocation5 + $0x8] sm:$0xff] }
 0x34f   : > { %2571 = vpow2.f32 %v1128_v28  ;;  %v1104_v37 = vsub.f32 %v3022_v40, %v1075_v27  ;;  %v1153_v36 = vld [vmem:[#allocation4 + $0x68] sm:$0xff] }
 0x350   : > { %v2566_v39 = vpop.eup %2565  ;;  %2573 = vpow2.f32 %v1134_v2 }
 0x351   : > { %v1132_v50 = vmul.f32 1.442695, %v1104_v37  ;;  %1190 = vadd.xlane.f32.xlu0 %v2566_v39  ;;  %v1160_v37 = vmul.f32 %v3168_v33, %v1144_v54  ;;  %v1155_v54 = vld [vmem:[#allocation4 + $0x78] sm:$0xff] }
 0x352   : > { %v1085_v29 = vpop.permute.xlu1 %1084 }
 0x353   : > { %2575 = vpow2.f32 %v1132_v50  ;;  %v1106_v38 = vsub.f32 %v3035_v42, %v1085_v29 }
 0x354   : > { %v2568_v53 = vpop.eup %2567  ;;  %2577 = vpow2.f32 %v1138_v46  ;;  %v1147_v46 = vld [vmem:[#allocation4 + $0x38] sm:$0xff] }
 0x355   : > { %v1136_v41 = vmul.f32 1.442695, %v1106_v38  ;;  %1188 = vadd.xlane.f32.xlu1 %v2568_v53  ;;  %2416 = vmatprep.mubr.f32.mxu1 %v2568_v53  ;;  %v1163_v43 = vmul.f32 %v3120_v44, %v1147_v46  ;;  %v1146_v38 = vld [vmem:[#allocation4 + $0x30] sm:$0xff] }
 0x356   : > { %2417 = vmatmul.mubr.f32.gmra.mxu1 %v2566_v39  ;;  %v1256_v21 = vpop.permute.xlu1 %1255 }
 0x357   : > { %2579 = vpow2.f32 %v1136_v41  ;;  %v1162_v41 = vmul.f32 %v3171_v48, %v1146_v38 }
 0x358   : > { %v2570_v13 = vpop.eup %2569  ;;  %2581 = vpow2.f32 %v1008_v52 }
 0x359   : > { %1194 = vadd.xlane.f32.xlu0 %v2570_v13  ;;  %2583 = vpow2.f32 %v1010_v57 }
 0x35a   : > { %v3213_v16 = vpop.permute.xlu1 %1265 }
 0x35c   : > { %v2572_v19 = vpop.eup %2571 }
 0x35d   : > { %v2574_v40 = vpop.eup %2573  ;;  %1192 = vadd.xlane.f32.xlu1 %v2572_v19  ;;  %2419 = vmatprep.mubr.f32.mxu1 %v2572_v19 }
 0x35e   : > { %1198 = vadd.xlane.f32.xlu0 %v2574_v40  ;;  %2420 = vmatmul.mubr.f32.gmra.mxu1 %v2570_v13  ;;  %v1271_v17 = vpop.permute.xlu1 %1270  ;;  %v1237_v13 = vld [vmem:[#allocation5] sm:$0xff] }
 0x35f   : > { %v1333_v52 = vmul.f32 %v1256_v21, %v1237_v13 }
 0x360   : > { %v2576_v30 = vpop.eup %2575 }
 0x361   : > { %v2578_v20 = vpop.eup %2577  ;;  %1196 = vadd.xlane.f32.xlu1 %v2576_v30  ;;  %2422 = vmatprep.mubr.f32.mxu1 %v2576_v30  ;;  %v1334_v30 = vmul.f32 %v1261_v47, %v1238_v59  ;;  %v1335_v47 = vmul.f32 %v3213_v16, %v1239_v5  ;;  %v1241_v59 = vld [vmem:[#allocation5 + $0x20] sm:$0xff] }
 0x362   : > { %1202 = vadd.xlane.f32.xlu0 %v2578_v20  ;;  %2423 = vmatmul.mubr.f32.gmra.mxu1 %v2574_v40  ;;  %v3219_v23 = vpop.permute.xlu1 %1275  ;;  %v1149_v40 = vld [vmem:[#allocation4 + $0x48] sm:$0xff]  ;;  %v1245_v5 = vld [vmem:[#allocation5 + $0x40] sm:$0xff] }
 0x363   : > { %v1165_v44 = vmul.f32 %v3123_v45, %v1149_v40 }
 0x364   : > { %v2580_v42 = vpop.eup %2579 }
 0x365   : > { %1200 = vadd.xlane.f32.xlu1 %v2580_v42  ;;  %2425 = vmatprep.mubr.f32.mxu1 %v2580_v42  ;;  %v3205_v51 = vpop.eup %2581 }
 0x366   : > { %2426 = vmatmul.mubr.f32.gmra.mxu1 %v2578_v20  ;;  %v3208_v22 = vpop.eup %2583  ;;  %v3223_v61 = vpop.permute.xlu1 %1285  ;;  %v1240_v20 = vld [vmem:[#allocation5 + $0x18] sm:$0xff] }
 0x367   : > { %v1171_v46 = vmul.f32 %v3208_v22, %v1155_v54 }
 0x36a   : > { %v3227_v7 = vpop.permute.xlu1 %1295 }
 0x36b   : > { %v1341_v10 = vmul.f32 %v3227_v7, %v1245_v5 }
 0x36e   : > { %v3232_v34 = vpop.permute.xlu1 %1305 }
 0x372   : > { %v3236_v25 = vpop.permute.xlu1 %1315 }
 0x376   : > { %1325 = vperm.xlu1 %2519, %v3205_v51  }
 0x378   : > { %1330 = vperm.xlu0 %2520, %v3208_v22   ;;  %v1337_v22 = vmul.f32 %v3219_v23, %v1241_v59  ;;  %v1246_v23 = vld [vmem:[#allocation5 + $0x48] sm:$0xff] }
 0x395   : > { %v1175_v8 = vpop.xlane.xlu0 %1174 }
 0x396   : > { %v1205_v31 = vadd.f32 %v1175_v8, %v1157_v63 }
 0x398   : > { %1222 = vst.msk [vmem:[#allocation4 + $0x8] sm:$0xff] %vm1220_vm5, %v1205_v31  ;;  %v1336_v31 = vmul.f32 %v1271_v17, %v1240_v20 }
 0x399   : > { %v1179_v0 = vpop.xlane.xlu0 %1178 }
 0x39a   : > { %v1207_v12 = vadd.f32 %v1179_v0, %v1159_v11 }
 0x39c   : > { %1224 = vst.msk [vmem:[#allocation4 + $0x18] sm:$0xff] %vm1220_vm5, %v1207_v12 }
 0x39d   : > { %v1177_v6 = vpop.xlane.xlu0 %1176 }
 0x39e   : > { %v1206_v15 = vadd.f32 %v1177_v6, %v1158_v1  ;;  %v1151_v1 = vld [vmem:[#allocation4 + $0x58] sm:$0xff] }
 0x39f   : > { %v1167_v16 = vmul.f32 %v3126_v49, %v1151_v1 }
 0x3a0   : > { %1223 = vst.msk [vmem:[#allocation4 + $0x10] sm:$0xff] %vm1220_vm5, %v1206_v15  ;;  %v1150_v15 = vld [vmem:[#allocation4 + $0x50] sm:$0xff] }
 0x3a1   : > { %v1183_v24 = vpop.xlane.xlu0 %1182  ;;  %v1166_v55 = vmul.f32 %v3177_v56, %v1150_v15  ;;  %v1251_v15 = vld [vmem:[#allocation5 + $0x70] sm:$0xff] }
 0x3a2   : > { %v1209_v2 = vadd.f32 %v1183_v24, %v1161_v26 }
 0x3a4   : > { %1226 = vst.msk [vmem:[#allocation4 + $0x28] sm:$0xff] %vm1220_vm5, %v1209_v2  ;;  %v1173_v28 = vpop.xlane.xlu1 %1172  ;;  %v1169_v2 = vmul.f32 %v3129_v60, %v1153_v36 }
 0x3a5   : > { %v1204_v27 = vadd.f32 %v1173_v28, %v1156_v18  ;;  %v1152_v18 = vld [vmem:[#allocation4 + $0x60] sm:$0xff] }
 0x3a6   : > { %v1168_v49 = vmul.f32 %v3180_v58, %v1152_v18  ;;  %v1242_v58 = vld [vmem:[#allocation5 + $0x28] sm:$0xff] }
 0x3a7   : > { %1221 = vst.msk [vmem:[#allocation4] sm:$0xff] %vm1220_vm5, %v1204_v27 }
 0x3ce   : > { %v1181_v39 = vpop.xlane.xlu1 %1180 }
 0x3cf   : > { %v1208_v50 = vadd.f32 %v1181_v39, %v1160_v37 }
 0x3d1   : > { %1225 = vst.msk [vmem:[#allocation4 + $0x20] sm:$0xff] %vm1220_vm5, %v1208_v50  ;;  %v1154_v50 = vld [vmem:[#allocation4 + $0x70] sm:$0xff] }
 0x3d2   : > { %v1187_v29 = vpop.xlane.xlu0 %1186  ;;  %v1170_v60 = vmul.f32 %v3205_v51, %v1154_v50  ;;  %v1243_v51 = vld [vmem:[#allocation5 + $0x30] sm:$0xff] }
 0x3d3   : > { %v1211_v53 = vadd.f32 %v1187_v29, %v1163_v43 }
 0x3d5   : > { %1228 = vst.msk [vmem:[#allocation4 + $0x38] sm:$0xff] %vm1220_vm5, %v1211_v53 }
 0x3d6   : > { %v1185_v19 = vpop.xlane.xlu1 %1184 }
 0x3d7   : > { %v1210_v33 = vadd.f32 %v1185_v19, %v1162_v41  ;;  %v1338_v41 = vmul.f32 %v3211_v14, %v1242_v58 }
 0x3d8   : > { %v2406_v42 = vpop.f32.mrf.mxu1 }
 0x3d9   : > { %1227 = vst.msk [vmem:[#allocation4 + $0x30] sm:$0xff] %vm1220_vm5, %v1210_v33  ;;  %v1543_v57 = vadd.f32 %v2406_v42, %v1334_v30  ;;  %v1244_v33 = vld [vmem:[#allocation5 + $0x38] sm:$0xff] }
 0x3da   : > { %v1463_v63 = vpop.f32.mrf.mxu1  ;;  %v1191_v8 = vpop.xlane.xlu0 %1190  ;;  %v1340_v20 = vmul.f32 %v3215_v9, %v1244_v33 }
 0x3db   : > { %1559 = vst.msk [vmem:[#allocation5 + $0x8] sm:$0xff] %vm658_vm4, %v1543_v57  ;;  %v1542_v48 = vadd.f32 %v1463_v63, %v1333_v52  ;;  %v1213_v11 = vadd.f32 %v1191_v8, %v1165_v44  ;;  %v1339_v52 = vmul.f32 %v3223_v61, %v1243_v51  ;;  %v1342_v63 = vmul.f32 %v3217_v3, %v1246_v23  ;;  %v1248_v61 = vld [vmem:[#allocation5 + $0x58] sm:$0xff]  ;;  %v1249_v3 = vld [vmem:[#allocation5 + $0x60] sm:$0xff] }
 0x3dc   : > { %v2409_v0 = vpop.f32.mrf.mxu1 }
 0x3dd   : > { %1558 = vst.msk [vmem:[#allocation5] sm:$0xff] %vm658_vm4, %v1542_v48  ;;  %v1545_v21 = vadd.f32 %v2409_v0, %v1336_v31  ;;  %v1344_v0 = vmul.f32 %v3221_v4, %v1248_v61 }
 0x3de   : > { %1230 = vst.msk [vmem:[#allocation4 + $0x48] sm:$0xff] %vm1220_vm5, %v1213_v11  ;;  %v1189_v45 = vpop.xlane.xlu1 %1188  ;;  %v1473_v12 = vpop.f32.mrf.mxu1  ;;  %v1247_v11 = vld [vmem:[#allocation5 + $0x50] sm:$0xff] }
 0x3df   : > { %1561 = vst.msk [vmem:[#allocation5 + $0x18] sm:$0xff] %vm658_vm4, %v1545_v21  ;;  %v1212_v17 = vadd.f32 %v1189_v45, %v1164_v32  ;;  %v1544_v6 = vadd.f32 %v1473_v12, %v1335_v47  ;;  %v1250_v47 = vld [vmem:[#allocation5 + $0x68] sm:$0xff]  ;;  %v1343_v32 = vmul.f32 %v3232_v34, %v1247_v11 }
 0x3e0   : > { %v1346_v7 = vmul.f32 %v3225_v62, %v1250_v47 }
 0x3e1   : > { %1229 = vst.msk [vmem:[#allocation4 + $0x40] sm:$0xff] %vm1220_vm5, %v1212_v17  ;;  %v1252_v17 = vld [vmem:[#allocation5 + $0x78] sm:$0xff] }
 0x3e2   : > { %1560 = vst.msk [vmem:[#allocation5 + $0x10] sm:$0xff] %vm658_vm4, %v1544_v6  ;;  %v1195_v35 = vpop.xlane.xlu0 %1194 }
 0x3e3   : > { %v1215_v26 = vadd.f32 %v1195_v35, %v1167_v16  ;;  %v1345_v35 = vmul.f32 %v3236_v25, %v1249_v3 }
 0x3e5   : > { %1232 = vst.msk [vmem:[#allocation4 + $0x58] sm:$0xff] %vm1220_vm5, %v1215_v26 }
 0x3e6   : > { %v1193_v24 = vpop.xlane.xlu1 %1192 }
 0x3e7   : > { %v1214_v28 = vadd.f32 %v1193_v24, %v1166_v55  ;;  %v1199_v27 = vpop.xlane.xlu0 %1198 }
 0x3e8   : > { %v1217_v37 = vadd.f32 %v1199_v27, %v1169_v2 }
 0x3e9   : > { %1231 = vst.msk [vmem:[#allocation4 + $0x50] sm:$0xff] %vm1220_vm5, %v1214_v28 }
 0x3ea   : > { %1234 = vst.msk [vmem:[#allocation4 + $0x68] sm:$0xff] %vm1220_vm5, %v1217_v37  ;;  %v1197_v39 = vpop.xlane.xlu1 %1196 }
 0x3eb   : > { %v1216_v43 = vadd.f32 %v1197_v39, %v1168_v49  ;;  %v1203_v56 = vpop.xlane.xlu0 %1202 }
 0x3ec   : > { %v1219_v29 = vadd.f32 %v1203_v56, %v1171_v46 }
 0x3ed   : > { %1233 = vst.msk [vmem:[#allocation4 + $0x60] sm:$0xff] %vm1220_vm5, %v1216_v43 }
 0x3ee   : > { %1236 = vst.msk [vmem:[#allocation4 + $0x78] sm:$0xff] %vm1220_vm5, %v1219_v29  ;;  %v1201_v38 = vpop.xlane.xlu1 %1200 }
 0x3ef   : > { %v1218_v53 = vadd.f32 %v1201_v38, %v1170_v60 }
 0x3f1   : > { %1235 = vst.msk [vmem:[#allocation4 + $0x70] sm:$0xff] %vm1220_vm5, %v1218_v53 }
 0x3f2   : > { %v1326_v26 = vpop.permute.xlu1 %1325 }
 0x3f3   : > { %v1331_v6 = vpop.permute.xlu0 %1330  ;;  %v1347_v62 = vmul.f32 %v1326_v26, %v1251_v15 }
 0x3f4   : > { %v1348_v34 = vmul.f32 %v1331_v6, %v1252_v17 }
 0x406   : > { %v2412_v13 = vpop.f32.mrf.mxu1 }
 0x407   : > { %v1547_v19 = vadd.f32 %v2412_v13, %v1338_v41 }
 0x408   : > { %v1483_v40 = vpop.f32.mrf.mxu1 }
 0x409   : > { %1563 = vst.msk [vmem:[#allocation5 + $0x28] sm:$0xff] %vm658_vm4, %v1547_v19  ;;  %v1546_v30 = vadd.f32 %v1483_v40, %v1337_v22 }
 0x40b   : > { %1562 = vst.msk [vmem:[#allocation5 + $0x20] sm:$0xff] %vm658_vm4, %v1546_v30 }
 0x40e   : > { %v2415_v42 = vpop.f32.mrf.mxu1 }
 0x40f   : > { %v1549_v57 = vadd.f32 %v2415_v42, %v1340_v20 }
 0x410   : > { %v1493_v44 = vpop.f32.mrf.mxu1 }
 0x411   : > { %1565 = vst.msk [vmem:[#allocation5 + $0x38] sm:$0xff] %vm658_vm4, %v1549_v57  ;;  %v1548_v14 = vadd.f32 %v1493_v44, %v1339_v52 }
 0x413   : > { %1564 = vst.msk [vmem:[#allocation5 + $0x30] sm:$0xff] %vm658_vm4, %v1548_v14 }
 0x416   : > { %v2418_v8 = vpop.f32.mrf.mxu1 }
 0x417   : > { %v1551_v31 = vadd.f32 %v2418_v8, %v1342_v63 }
 0x418   : > { %v1503_v48 = vpop.f32.mrf.mxu1 }
 0x419   : > { %1567 = vst.msk [vmem:[#allocation5 + $0x48] sm:$0xff] %vm658_vm4, %v1551_v31  ;;  %v1550_v9 = vadd.f32 %v1503_v48, %v1341_v10 }
 0x41b   : > { %1566 = vst.msk [vmem:[#allocation5 + $0x40] sm:$0xff] %vm658_vm4, %v1550_v9 }
 0x41e   : > { %v2421_v21 = vpop.f32.mrf.mxu1 }
 0x41f   : > { %v1553_v45 = vadd.f32 %v2421_v21, %v1344_v0 }
 0x420   : > { %v1513_v12 = vpop.f32.mrf.mxu1 }
 0x421   : > { %1569 = vst.msk [vmem:[#allocation5 + $0x58] sm:$0xff] %vm658_vm4, %v1553_v45  ;;  %v1552_v1 = vadd.f32 %v1513_v12, %v1343_v32 }
 0x422   : > { %v2424_v16 = vpop.f32.mrf.mxu1 }
 0x423   : > { %1568 = vst.msk [vmem:[#allocation5 + $0x50] sm:$0xff] %vm658_vm4, %v1552_v1  ;;  %v1555_v4 = vadd.f32 %v2424_v16, %v1346_v7 }
 0x424   : > { %v1523_v36 = vpop.f32.mrf.mxu1 }
 0x425   : > { %1571 = vst.msk [vmem:[#allocation5 + $0x68] sm:$0xff] %vm658_vm4, %v1555_v4  ;;  %v1554_v55 = vadd.f32 %v1523_v36, %v1345_v35 }
 0x426   : > { %v2427_v24 = vpop.f32.mrf.mxu1 }
 0x427   : > { %1570 = vst.msk [vmem:[#allocation5 + $0x60] sm:$0xff] %vm658_vm4, %v1554_v55  ;;  %v1557_v2 = vadd.f32 %v2427_v24, %v1348_v34  ;;  %1593 = sbr.rel (%p2171_p10) target bundleno = 1438 (0x59e), region = 52 }
 0x428   : > { %v1533_v18 = vpop.f32.mrf.mxu1 }
 0x429   : > { %1573 = vst.msk [vmem:[#allocation5 + $0x78] sm:$0xff] %vm658_vm4, %v1557_v2  ;;  %v1556_v28 = vadd.f32 %v1533_v18, %v1347_v62 }
 0x42b   : > { %1572 = vst.msk [vmem:[#allocation5 + $0x70] sm:$0xff] %vm658_vm4, %v1556_v28 }
 0x42c   : > { %v1611_v25 = vld [vmem:[#allocation4 + $0x8] sm:$0xff]  ;;  %v1610_v27 = vld [vmem:[#allocation4] sm:$0xff]  ;;  %v2679_v37 = vmov 0   ;;  %v1620_v39 = vld [vmem:[#allocation4 + $0x50] sm:$0xff]  ;;  %vm1794_vm6 = vcmask 1041408   ;;  %vm1975_vm7 = vcmask 31744  }
 0x42d   : > { %v1619_v54 = vld [vmem:[#allocation4 + $0x48] sm:$0xff]  ;;  %2586 = vset.pattern.permute.xlu1 %v2679_v37  ;;  %2585 = vset.pattern.permute.xlu0 %v2679_v37  ;;  %2587 = vrcp.f32 %v1611_v25  ;;  %v1618_v49 = vld [vmem:[#allocation4 + $0x40] sm:$0xff]  ;;  %v1612_v46 = vld [vmem:[#allocation4 + $0x10] sm:$0xff] }
 0x42e   : > { %2589 = vrcp.f32 %v1610_v27  ;;  %v1621_v50 = vld [vmem:[#allocation4 + $0x58] sm:$0xff]  ;;  %v1738_v56 = vld [vmem:[%s3406_s4] sm:$0x3]  ;;  %v1623_v59 = vld [vmem:[#allocation4 + $0x68] sm:$0xff] }
 0x42f   : > { %2591 = vrcp.f32 %v1619_v54  ;;  %v1613_v43 = vld [vmem:[#allocation4 + $0x18] sm:$0xff]  ;;  %v1622_v29 = vld [vmem:[#allocation4 + $0x60] sm:$0xff]  ;;  %2428 = vmatprep.subr.msk.mxu0 %vm1794_vm6, %v1738_v56  ;;  %2456 = vmatprep.subr.msk.mxu1 %vm1794_vm6, %v1738_v56  ;;  %v1615_v13 = vld [vmem:[#allocation4 + $0x28] sm:$0xff] }
 0x430   : > { %2593 = vrcp.f32 %v1618_v49  ;;  %v1614_v60 = vld [vmem:[#allocation4 + $0x20] sm:$0xff]  ;;  %2429 = vmatpush3.msk.msra.mxu0 %vm1794_vm6, %v1738_v56  ;;  %2457 = vmatpush3.msk.msra.mxu1 %vm1794_vm6, %v1738_v56  ;;  %v1624_v19 = vld [vmem:[#allocation4 + $0x70] sm:$0xff]  ;;  %v1625_v51 = vld [vmem:[#allocation4 + $0x78] sm:$0xff] }
 0x431   : > { %2595 = vrcp.f32 %v1620_v39  ;;  %v1616_v30 = vld [vmem:[#allocation4 + $0x30] sm:$0xff]  ;;  %v1617_v42 = vld [vmem:[#allocation4 + $0x38] sm:$0xff]  ;;  %v1595_v10 = vld [vmem:[#allocation5 + $0x8] sm:$0xff] }
 0x432   : > { %2597 = vrcp.f32 %v1612_v46  ;;  %v1594_v31 = vld [vmem:[#allocation5] sm:$0xff]  ;;  %v1603_v0 = vld [vmem:[#allocation5 + $0x48] sm:$0xff]  ;;  %v1604_v12 = vld [vmem:[#allocation5 + $0x50] sm:$0xff] }
 0x433   : > { %2599 = vrcp.f32 %v1621_v50  ;;  %v1602_v47 = vld [vmem:[#allocation5 + $0x40] sm:$0xff]  ;;  %v1596_v7 = vld [vmem:[#allocation5 + $0x10] sm:$0xff]  ;;  %v1605_v35 = vld [vmem:[#allocation5 + $0x58] sm:$0xff] }
 0x434   : > { %2601 = vrcp.f32 %v1613_v43  ;;  %v1597_v4 = vld [vmem:[#allocation5 + $0x18] sm:$0xff]  ;;  %v1606_v55 = vld [vmem:[#allocation5 + $0x60] sm:$0xff]  ;;  %v1607_v25 = vld [vmem:[#allocation5 + $0x68] sm:$0xff] }
 0x435   : > { %2603 = vrcp.f32 %v1622_v29  ;;  %v1598_v24 = vld [vmem:[#allocation5 + $0x20] sm:$0xff]  ;;  %v1599_v27 = vld [vmem:[#allocation5 + $0x28] sm:$0xff]  ;;  %v1608_v46 = vld [vmem:[#allocation5 + $0x70] sm:$0xff] }
 0x436   : > { %2605 = vrcp.f32 %v1614_v60  ;;  %v1600_v50 = vld [vmem:[#allocation5 + $0x30] sm:$0xff] }
 0x437   : > { %2607 = vrcp.f32 %v1623_v59 }
 0x438   : > { %2609 = vrcp.f32 %v1615_v13 }
 0x439   : > { %2611 = vrcp.f32 %v1624_v19 }
 0x43a   : > { %v2588_v38 = vpop.eup %2587  ;;  %2613 = vrcp.f32 %v1616_v30 }
 0x43b   : > { %v2590_v53 = vpop.eup %2589  ;;  %1649 = vperm.xlu1 %2586, %v2588_v38   ;;  %2615 = vrcp.f32 %v1625_v51  ;;  %v1609_v38 = vld [vmem:[#allocation5 + $0x78] sm:$0xff]  ;;  %v1943_v51 = vld [vmem:[%s2763_s14] sm:$0xff] }
 0x43c   : > { %v2592_v58 = vpop.eup %2591  ;;  %1644 = vperm.xlu0 %2585, %v2590_v53   ;;  %2617 = vrcp.f32 %v1617_v42  ;;  %v1601_v53 = vld [vmem:[#allocation5 + $0x38] sm:$0xff] }
 0x43d   : > { %v2594_v41 = vpop.eup %2593 }
 0x43e   : > { %v2596_v22 = vpop.eup %2595 }
 0x43f   : > { %1689 = vperm.xlu1 %2586, %v2592_v58   ;;  %v2598_v40 = vpop.eup %2597 }
 0x440   : > { %1684 = vperm.xlu0 %2585, %v2594_v41   ;;  %v2600_v33 = vpop.eup %2599 }
 0x441   : > { %v2602_v20 = vpop.eup %2601 }
 0x442   : > { %v2604_v52 = vpop.eup %2603 }
 0x443   : > { %1694 = vperm.xlu1 %2586, %v2596_v22   ;;  %v2606_v57 = vpop.eup %2605  ;;  %v3315_v22 = vld [vmem:[%s3407_s5] ss:$0 sm:$0xff] }
 0x444   : > { %1654 = vperm.xlu0 %2585, %v2598_v40   ;;  %v2608_v44 = vpop.eup %2607  ;;  %v1944_v40 = vld [vmem:[%s2763_s14 + $0x8] sm:$0xff] }
 0x445   : > { %v2610_v14 = vpop.eup %2609 }
 0x446   : > { %v2612_v23 = vpop.eup %2611 }
 0x447   : > { %1699 = vperm.xlu1 %2586, %v2600_v33   ;;  %v2614_v5 = vpop.eup %2613 }
 0x448   : > { %1659 = vperm.xlu0 %2585, %v2602_v20   ;;  %v2616_v63 = vpop.eup %2615 }
 0x449   : > { %v2618_v8 = vpop.eup %2617 }
 0x44b   : > { %1704 = vperm.xlu1 %2586, %v2604_v52  }
 0x44c   : > { %1664 = vperm.xlu0 %2585, %v2606_v57   ;;  %v1952_v57 = vld [vmem:[%s2763_s14 + $0x48] sm:$0xff] }
 0x44f   : > { %1709 = vperm.xlu1 %2586, %v2608_v44  }
 0x450   : > { %1669 = vperm.xlu0 %2585, %v2610_v14  }
 0x453   : > { %1714 = vperm.xlu1 %2586, %v2612_v23  }
 0x454   : > { %1674 = vperm.xlu0 %2585, %v2614_v5   ;;  %v1951_v5 = vld [vmem:[%s2763_s14 + $0x40] sm:$0xff] }
 0x457   : > { %1719 = vperm.xlu1 %2586, %v2616_v63  }
 0x458   : > { %1679 = vperm.xlu0 %2585, %v2618_v8  }
 0x4b6   : > { %v1650_v48 = vpop.permute.xlu1 %1649 }
 0x4b7   : > { %v1723_v9 = vmul.f32 %v1650_v48, %v1595_v10  ;;  %v1645_v61 = vpop.permute.xlu0 %1644  ;;  %v1954_v48 = vld [vmem:[%s2763_s14 + $0x58] sm:$0xff] }
 0x4b8   : > { %v1722_v11 = vmul.f32 %v1645_v61, %v1594_v31  ;;  %v1946_v61 = vld [vmem:[%s2763_s14 + $0x18] sm:$0xff] }
 0x4ba   : > { %2430 = vmatprep.mubr.msk.f32.mxu0 %vm658_vm4, %v1722_v11  ;;  %v1690_v21 = vpop.permute.xlu1 %1689 }
 0x4bb   : > { %v1731_v32 = vmul.f32 %v1690_v21, %v1603_v0  ;;  %v1685_v45 = vpop.permute.xlu0 %1684  ;;  %2431 = vmatmul.mubr.msk.f32.vlgmr.msra.gmra.mxu0 %vm658_vm4, %v1723_v9  ;;  %v1953_v21 = vld [vmem:[%s2763_s14 + $0x50] sm:$0xff] }
 0x4bc   : > { %v1730_v3 = vmul.f32 %v1685_v45, %v1602_v47 }
 0x4be   : > { %2442 = vmatprep.mubr.msk.f32.mxu1 %vm658_vm4, %v1730_v3  ;;  %v1695_v1 = vpop.permute.xlu1 %1694  ;;  %v1945_v3 = vld [vmem:[%s2763_s14 + $0x10] sm:$0xff] }
 0x4bf   : > { %v1732_v17 = vmul.f32 %v1695_v1, %v1604_v12  ;;  %v1655_v6 = vpop.permute.xlu0 %1654  ;;  %2443 = vmatmul.mubr.msk.f32.vlgmr.msra.gmra.mxu1 %vm658_vm4, %v1731_v32 }
 0x4c0   : > { %v1724_v16 = vmul.f32 %v1655_v6, %v1596_v7 }
 0x4c1   : > { %2445 = vmatprep.mubr.msk.f32.mxu1 %vm658_vm4, %v1732_v17 }
 0x4c2   : > { %2433 = vmatprep.mubr.msk.f32.mxu0 %vm658_vm4, %v1724_v16  ;;  %v1700_v15 = vpop.permute.xlu1 %1699 }
 0x4c3   : > { %v1733_v26 = vmul.f32 %v1700_v15, %v1605_v35  ;;  %v1660_v36 = vpop.permute.xlu0 %1659  ;;  %v1956_v35 = vld [vmem:[%s2763_s14 + $0x68] sm:$0xff] }
 0x4c4   : > { %v1725_v34 = vmul.f32 %v1660_v36, %v1597_v4  ;;  %v1948_v15 = vld [vmem:[%s2763_s14 + $0x28] sm:$0xff] }
 0x4c5   : > { %2446 = vmatmul.mubr.msk.f32.gmra.mxu1 %vm658_vm4, %v1733_v26 }
 0x4c6   : > { %2434 = vmatmul.mubr.msk.f32.gmra.mxu0 %vm658_vm4, %v1725_v34  ;;  %v1705_v62 = vpop.permute.xlu1 %1704 }
 0x4c7   : > { %v1734_v2 = vmul.f32 %v1705_v62, %v1606_v55  ;;  %v1665_v18 = vpop.permute.xlu0 %1664  ;;  %v1955_v55 = vld [vmem:[%s2763_s14 + $0x60] sm:$0xff] }
 0x4c8   : > { %v1726_v28 = vmul.f32 %v1665_v18, %v1598_v24 }
 0x4c9   : > { %2448 = vmatprep.mubr.msk.f32.mxu1 %vm658_vm4, %v1734_v2  ;;  %v1947_v2 = vld [vmem:[%s2763_s14 + $0x20] sm:$0xff] }
 0x4ca   : > { %2436 = vmatprep.mubr.msk.f32.mxu0 %vm658_vm4, %v1726_v28  ;;  %v1710_v54 = vpop.permute.xlu1 %1709 }
 0x4cb   : > { %v1735_v37 = vmul.f32 %v1710_v54, %v1607_v25  ;;  %v1670_v49 = vpop.permute.xlu0 %1669 }
 0x4cc   : > { %v1727_v39 = vmul.f32 %v1670_v49, %v1599_v27  ;;  %v1958_v49 = vld [vmem:[%s2763_s14 + $0x78] sm:$0xff] }
 0x4cd   : > { %2449 = vmatmul.mubr.msk.f32.gmra.mxu1 %vm658_vm4, %v1735_v37 }
 0x4ce   : > { %2437 = vmatmul.mubr.msk.f32.gmra.mxu0 %vm658_vm4, %v1727_v39  ;;  %v1715_v43 = vpop.permute.xlu1 %1714 }
 0x4cf   : > { %v1736_v56 = vmul.f32 %v1715_v43, %v1608_v46  ;;  %v1675_v29 = vpop.permute.xlu0 %1674  ;;  %v1950_v46 = vld [vmem:[%s2763_s14 + $0x38] sm:$0xff] }
 0x4d0   : > { %v1728_v60 = vmul.f32 %v1675_v29, %v1600_v50  ;;  %v1957_v29 = vld [vmem:[%s2763_s14 + $0x70] sm:$0xff] }
 0x4d1   : > { %2451 = vmatprep.mubr.msk.f32.mxu1 %vm658_vm4, %v1736_v56 }
 0x4d2   : > { %2439 = vmatprep.mubr.msk.f32.mxu0 %vm658_vm4, %v1728_v60  ;;  %v1720_v58 = vpop.permute.xlu1 %1719 }
 0x4d3   : > { %v1737_v59 = vmul.f32 %v1720_v58, %v1609_v38  ;;  %v1680_v41 = vpop.permute.xlu0 %1679 }
 0x4d4   : > { %v1729_v13 = vmul.f32 %v1680_v41, %v1601_v53  ;;  %v1949_v53 = vld [vmem:[%s2763_s14 + $0x30] sm:$0xff] }
 0x4d5   : > { %2452 = vmatmul.mubr.msk.f32.gmra.mxu1 %vm658_vm4, %v1737_v59 }
 0x4d6   : > { %2440 = vmatmul.mubr.msk.f32.gmra.mxu0 %vm658_vm4, %v1729_v13 }
 0x57b   : > { %v2432_v19 = vpop.f32.mrf.mxu0 }
 0x57c   : > { %v1870_v30 = vadd.f32 %v2432_v19, %v3315_v22 }
 0x57d   : > { %v1864_v33 = vpop.f32.mrf.mxu0 }
 0x57e   : > { %v1960_v20 = vadd.f32 %v1944_v40, %v1870_v30  ;;  %v1865_v42 = vadd.f32 %v3315_v22, %v1864_v33 }
 0x57f   : > { %v2444_v52 = vpop.f32.mrf.mxu1 }
 0x580   : > { %1977 = vst.msk [vmem:[%s2768_s17 + $0x8] sm:$0xff] %vm1975_vm7, %v1960_v20  ;;  %v1959_v44 = vadd.f32 %v1943_v51, %v1865_v42  ;;  %v1910_v14 = vadd.f32 %v2444_v52, %v3315_v22 }
 0x581   : > { %v1904_v23 = vpop.f32.mrf.mxu1 }
 0x582   : > { %1976 = vst.msk [vmem:[%s2768_s17] sm:$0xff] %vm1975_vm7, %v1959_v44  ;;  %v1968_v63 = vadd.f32 %v1952_v57, %v1910_v14  ;;  %v1905_v8 = vadd.f32 %v3315_v22, %v1904_v23 }
 0x584   : > { %1985 = vst.msk [vmem:[%s2768_s17 + $0x48] sm:$0xff] %vm1975_vm7, %v1968_v63  ;;  %v1967_v10 = vadd.f32 %v1951_v5, %v1905_v8 }
 0x585   : > { %v2447_v31 = vpop.f32.mrf.mxu1 }
 0x586   : > { %1984 = vst.msk [vmem:[%s2768_s17 + $0x40] sm:$0xff] %vm1975_vm7, %v1967_v10  ;;  %v2435_v9 = vpop.f32.mrf.mxu0  ;;  %v1920_v11 = vadd.f32 %v2447_v31, %v3315_v22 }
 0x587   : > { %v1880_v0 = vadd.f32 %v2435_v9, %v3315_v22  ;;  %v1914_v47 = vpop.f32.mrf.mxu1 }
 0x588   : > { %v1970_v32 = vadd.f32 %v1954_v48, %v1920_v11  ;;  %v1874_v45 = vpop.f32.mrf.mxu0  ;;  %v1915_v12 = vadd.f32 %v3315_v22, %v1914_v47 }
 0x589   : > { %v1962_v7 = vadd.f32 %v1946_v61, %v1880_v0  ;;  %v1875_v1 = vadd.f32 %v3315_v22, %v1874_v45 }
 0x58a   : > { %1987 = vst.msk [vmem:[%s2768_s17 + $0x58] sm:$0xff] %vm1975_vm7, %v1970_v32  ;;  %v1969_v17 = vadd.f32 %v1953_v21, %v1915_v12 }
 0x58b   : > { %1979 = vst.msk [vmem:[%s2768_s17 + $0x18] sm:$0xff] %vm1975_vm7, %v1962_v7  ;;  %v1961_v6 = vadd.f32 %v1945_v3, %v1875_v1 }
 0x58c   : > { %1986 = vst.msk [vmem:[%s2768_s17 + $0x50] sm:$0xff] %vm1975_vm7, %v1969_v17 }
 0x58d   : > { %1978 = vst.msk [vmem:[%s2768_s17 + $0x10] sm:$0xff] %vm1975_vm7, %v1961_v6  ;;  %v2450_v16 = vpop.f32.mrf.mxu1 }
 0x58e   : > { %v2438_v4 = vpop.f32.mrf.mxu0  ;;  %v1930_v26 = vadd.f32 %v2450_v16, %v3315_v22 }
 0x58f   : > { %v1890_v36 = vadd.f32 %v2438_v4, %v3315_v22  ;;  %v1924_v34 = vpop.f32.mrf.mxu1 }
 0x590   : > { %v1972_v24 = vadd.f32 %v1956_v35, %v1930_v26  ;;  %v1884_v62 = vpop.f32.mrf.mxu0  ;;  %v1925_v18 = vadd.f32 %v3315_v22, %v1924_v34 }
 0x591   : > { %v1964_v28 = vadd.f32 %v1948_v15, %v1890_v36  ;;  %v1885_v25 = vadd.f32 %v3315_v22, %v1884_v62 }
 0x592   : > { %1989 = vst.msk [vmem:[%s2768_s17 + $0x68] sm:$0xff] %vm1975_vm7, %v1972_v24  ;;  %v1971_v27 = vadd.f32 %v1955_v55, %v1925_v18 }
 0x593   : > { %1981 = vst.msk [vmem:[%s2768_s17 + $0x28] sm:$0xff] %vm1975_vm7, %v1964_v28  ;;  %v1963_v54 = vadd.f32 %v1947_v2, %v1885_v25 }
 0x594   : > { %1988 = vst.msk [vmem:[%s2768_s17 + $0x60] sm:$0xff] %vm1975_vm7, %v1971_v27 }
 0x595   : > { %1980 = vst.msk [vmem:[%s2768_s17 + $0x20] sm:$0xff] %vm1975_vm7, %v1963_v54  ;;  %v2453_v37 = vpop.f32.mrf.mxu1 }
 0x596   : > { %v2441_v39 = vpop.f32.mrf.mxu0  ;;  %v1940_v50 = vadd.f32 %v2453_v37, %v3315_v22 }
 0x597   : > { %v1900_v43 = vadd.f32 %v2441_v39, %v3315_v22  ;;  %v1934_v56 = vpop.f32.mrf.mxu1 }
 0x598   : > { %v1974_v60 = vadd.f32 %v1958_v49, %v1940_v50  ;;  %v1894_v38 = vpop.f32.mrf.mxu0  ;;  %v1935_v58 = vadd.f32 %v3315_v22, %v1934_v56 }
 0x599   : > { %v1966_v59 = vadd.f32 %v1950_v46, %v1900_v43  ;;  %v1895_v41 = vadd.f32 %v3315_v22, %v1894_v38 }
 0x59a   : > { %1991 = vst.msk [vmem:[%s2768_s17 + $0x78] sm:$0xff] %vm1975_vm7, %v1974_v60  ;;  %v1973_v13 = vadd.f32 %v1957_v29, %v1935_v58 }
 0x59b   : > { %1983 = vst.msk [vmem:[%s2768_s17 + $0x38] sm:$0xff] %vm1975_vm7, %v1966_v59  ;;  %v1965_v19 = vadd.f32 %v1949_v53, %v1895_v41 }
 0x59c   : > { %1990 = vst.msk [vmem:[%s2768_s17 + $0x70] sm:$0xff] %vm1975_vm7, %v1973_v13 }
 0x59d   : > { %1982 = vst.msk [vmem:[%s2768_s17 + $0x30] sm:$0xff] %vm1975_vm7, %v1965_v19 }
 0x59e PF: > { %s16_s27 = sadd.s32 1, %s2673_s27   ;;  %s3409_s21 = smov %s2661_s24 }
 0x59f   : > { %p13_p11 = scmp.ge.s32.totalorder %s16_s27, 10   ;;  %s3410_s22 = smov %s2665_s25 }
 0x5a0   : > { %s3411_s23 = smov %s2669_s26  ;;  %s3412_s24 = smov %s3416_s28 }
 0x5a1   : > { %s3413_s25 = smov %s3420_s29  ;;  %s3414_s26 = smov %s3424_s30 }
 0x5a2   :  { %15 = sbr.rel (!%p13_p11) target bundleno = 4 (0x4), region = 85 }

</bundles_post_ra>
